<compile_context>
chip_gen: v5e
topology: v5e:2x2
jax: 0.10.0
libtpu: 0.0.40
codegen_flags: <defaults>
</compile_context>

<pallas_src>
import functools

import numpy as np
import jax
import jax.numpy as jnp
from jax.experimental import pallas as pl
from jax.experimental.pallas import tpu as pltpu


# ----------------------------------------------------------------------------
# small helpers
# ----------------------------------------------------------------------------
def _round_up(x, m):
    return ((x + m - 1) // m) * m


def _tree_add(xs):
    """Pairwise (tree) sum to shorten the accumulation dependence chain."""
    xs = list(xs)
    while len(xs) > 1:
        nxt = [xs[i] + xs[i + 1] for i in range(0, len(xs) - 1, 2)]
        if len(xs) % 2:
            nxt.append(xs[-1])
        xs = nxt
    return xs[0]


def _bilinear_src_np(out_size, in_size):
    """PyTorch F.interpolate(mode='bilinear', align_corners=False) source taps."""
    scale = in_size / out_size
    coord = (np.arange(out_size, dtype=np.float64) + 0.5) * scale - 0.5
    coord = np.maximum(coord, 0.0)
    i0 = np.minimum(np.floor(coord), in_size - 1).astype(np.int64)
    i1 = np.minimum(i0 + 1, in_size - 1)
    return i0, i1, coord - i0


def _make_upsample_matrix(src_h, src_w, src_stride, dst_h, dst_w, dst_stride,
                          n_cols, pad=2):
    """[src_h*src_stride, n_cols] matrix folding bilinear resize + relayout.

    Source: feature plane in 'wide' layout (row stride src_stride, valid cols
    [0, src_w)).  Destination: the head's padded flattened plane (row stride
    dst_stride, interior starts at offset `pad`), zeros everywhere else.
    """
    m = np.zeros((src_h * src_stride, n_cols), np.float32)
    y0, y1, fy = _bilinear_src_np(dst_h, src_h)
    x0, x1, fx = _bilinear_src_np(dst_w, src_w)
    for y in range(dst_h):
        for x in range(dst_w):
            p = (y + pad) * dst_stride + (x + pad)
            for iy, wy in ((y0[y], 1.0 - fy[y]), (y1[y], fy[y])):
                for ix, wx in ((x0[x], 1.0 - fx[x]), (x1[x], fx[x])):
                    m[iy * src_stride + ix, p] += wy * wx
    return m


# ----------------------------------------------------------------------------
# the fused decoder kernel (one image per grid step)
# ----------------------------------------------------------------------------
def _decoder_kernel(*refs, meta):
    nb = len(meta["branches"])
    xs = refs[0:nb]                  # per-branch zero-padded flattened planes
    fpack = refs[nb]                 # f32: depthwise taps + all biases
    wpack = refs[nb + 1]             # f32: all folded-BN matmul weights
    mask = refs[nb + 2]              # (1, qpre) interior mask for pre_cls
    rmats = refs[nb + 3:-2]          # bf16 upsample matrices (resized branches)
    o_ref = refs[-2]                 # (1, ncls_pad, qclf)
    hscr = refs[-1]                  # (cc, lin_h) f32 staging plane

    oup = meta["oup"]
    cc, ncp = meta["cc"], meta["ncls_pad"]
    h, w = meta["h"], meta["w"]
    wp_h, qpre, qclf = meta["wp_h"], meta["qpre"], meta["qclf"]

    # head-input staging plane: concat'd ASPP features, zero-padded by 2,
    # flattened row-major with row stride wp_h (zeros outside the interior).
    hscr[...] = jnp.zeros_like(hscr)

    r_idx = 0
    for b, bm in enumerate(meta["branches"]):
        cin, rate, wp, q = bm["cin"], bm["rate"], bm["wp"], bm["q"]
        x = xs[b]

        # ---- sep3x3 part 1: depthwise dilated 3x3 + folded BN + ReLU (VPU, f32)
        dww = fpack[:cin, bm["c_dw"]:bm["c_dw"] + 9]
        taps = []
        for k in range(9):
            s = (k // 3) * rate * wp + (k % 3) * rate
            taps.append(x[0, :, s:s + q] * dww[:, k:k + 1])
        dw = jnp.maximum(
            _tree_add(taps) + fpack[:cin, bm["c_bdw"]:bm["c_bdw"] + 1], 0.0)

        # ---- sep3x3 part 2 (1x1) and the parallel conv1x1 branch fused as ONE
        #      block-diagonal dot [[pw,0],[0,c1]], then conv_last (MXU, bf16)
        c0 = rate * wp + rate                       # centre tap of the padded plane
        z = jnp.concatenate([dw, x[0, :, c0:c0 + q]], axis=0).astype(jnp.bfloat16)
        wbd = wpack[:2 * oup, bm["c_wbd"]:bm["c_wbd"] + 2 * cin].astype(jnp.bfloat16)
        br = jnp.dot(wbd, z, preferred_element_type=jnp.float32)
        br = jnp.maximum(br + fpack[:2 * oup, bm["c_b2"]:bm["c_b2"] + 1], 0.0)
        wcl = wpack[:oup, bm["c_wcl"]:bm["c_wcl"] + 2 * oup].astype(jnp.bfloat16)
        at = jnp.dot(wcl, br.astype(jnp.bfloat16), preferred_element_type=jnp.float32)
        at = jnp.maximum(at + fpack[:oup, bm["c_bcl"]:bm["c_bcl"] + 1], 0.0)

        # ---- place into the head staging plane (never leaves VMEM)
        if bm["resize"]:
            # bilinear upsample + relayout folded into one constant matrix ->
            # a single small MXU dot already in the head's padded layout.
            up = jnp.dot(at.astype(jnp.bfloat16), rmats[r_idx][...],
                         preferred_element_type=jnp.float32)
            r_idx += 1
            hscr[b * oup:(b + 1) * oup, :] = up
        else:
            # same resolution: copy the valid columns of every row.
            for r in range(h):
                dst = (r + 2) * wp_h + 2
                hscr[b * oup:(b + 1) * oup, dst:dst + w] = at[:, r * wp:r * wp + w]

    # ---- head: pre_cls (3x3 + BN + ReLU) -> clf (3x3 + bias) -> sigmoid,
    #      the 9 taps of each conv stacked along the contraction dim (one dot each)
    offs = [dy * wp_h + dx for dy in range(3) for dx in range(3)]
    z_pre = jnp.concatenate(
        [hscr[:, s:s + qpre].astype(jnp.bfloat16) for s in offs], axis=0)
    w_pre = wpack[:cc, meta["c_wpre"]:meta["c_wpre"] + 9 * cc].astype(jnp.bfloat16)
    y = jnp.dot(w_pre, z_pre, preferred_element_type=jnp.float32)
    y = jnp.maximum(y + fpack[:cc, meta["c_bpre"]:meta["c_bpre"] + 1], 0.0)
    y = (y * mask[...]).astype(jnp.bfloat16)        # zero border / junk columns

    z_clf = jnp.concatenate([y[:, s:s + qclf] for s in offs], axis=0)
    w_clf = wpack[:ncp, meta["c_wclf"]:meta["c_wclf"] + 9 * cc].astype(jnp.bfloat16)
    logit = jnp.dot(w_clf, z_clf, preferred_element_type=jnp.float32)
    o_ref[0] = jax.nn.sigmoid(logit + fpack[:ncp, meta["c_bclf"]:meta["c_bclf"] + 1])


# ----------------------------------------------------------------------------
# wrapper
# ----------------------------------------------------------------------------
def decoder_forward(xs_nchw, kp):
    """Eval-mode AutoDeepLabDecoder forward.  NCHW inputs -> NCHW prediction."""
    meta = kp["meta"]
    nb = len(meta["branches"])
    assert len(xs_nchw) == nb
    n = xs_nchw[0].shape[0]
    h, w, wp_h = meta["h"], meta["w"], meta["wp_h"]
    ncls, ncp, qclf = meta["ncls"], meta["ncls_pad"], meta["qclf"]

    operands, in_specs = [], []
    for x, bm in zip(xs_nchw, meta["branches"]):
        assert x.shape[1:] == (bm["cin"], bm["h_i"], bm["w_i"]), x.shape
        r = bm["rate"]
        # single pad builds the zero border AND the zero tail the taps read
        # past the last row, then one flattening reshape (no second pad).
        xp = jnp.pad(x.astype(jnp.float32),
                     ((0, 0), (0, 0), (r, r + bm["extra_rows"]), (r, r)))
        operands.append(xp.reshape(n, bm["cin"], bm["lin"]))
        in_specs.append(pl.BlockSpec((1, bm["cin"], bm["lin"]), lambda i: (i, 0, 0)))
    for arr in (kp["fpack"], kp["wpack"], kp["mask"], *kp["rmats"]):
        operands.append(arr)
        in_specs.append(pl.BlockSpec(arr.shape, lambda i: (0, 0)))

    out = pl.pallas_call(
        functools.partial(_decoder_kernel, meta=meta),
        out_shape=jax.ShapeDtypeStruct((n, ncp, qclf), jnp.float32),
        grid=(n,),
        in_specs=in_specs,
        out_specs=pl.BlockSpec((1, ncp, qclf), lambda i: (i, 0, 0)),
        scratch_shapes=[pltpu.VMEM((meta["cc"], meta["lin_h"]), jnp.float32)],
        compiler_params=pltpu.CompilerParams(dimension_semantics=("parallel",)),
    )(*operands)

    # valid clf outputs live at row stride wp_h; drop junk columns / pad classes
    return out[:, :ncls, :h * wp_h].reshape(n, ncls, h, wp_h)[..., :w]


# ----------------------------------------------------------------------------
# deterministic "PyTorch-like" parameters, kernel packing, f32 reference
# ----------------------------------------------------------------------------
def _bn_params(key, c, affine):
    k1, k2, k3, k4 = jax.random.split(key, 4)
    p = dict(mean=0.1 * jax.random.normal(k1, (c,), jnp.float32),
             var=jax.random.uniform(k2, (c,), jnp.float32, minval=0.5, maxval=1.5))
    if affine:
        p["gamma"] = 1.0 + 0.1 * jax.random.normal(k3, (c,), jnp.float32)
        p["beta"] = 0.1 * jax.random.normal(k4, (c,), jnp.float32)
    else:
        p["gamma"] = jnp.ones((c,), jnp.float32)
        p["beta"] = jnp.zeros((c,), jnp.float32)
    return p


def make_raw_params(key, out_strides, bxf, in_channel, meta_mode="Scale", affine=True):
    oup = bxf
    aspps = []
    for i, s in enumerate(out_strides):
        if meta_mode == "Scale":
            rate, cin = 32 // s, int(bxf * s // 4)
        else:
            rate, cin = int(s), int(bxf * 2 ** i)
        key, k0, k1, k2, k3, k4, k5, k6, k7 = jax.random.split(key, 9)
        aspps.append(dict(
            rate=rate,
            dw_w=0.1 * jax.random.normal(k0, (cin, 1, 3, 3), jnp.float32),
            dw_bn=_bn_params(k1, cin, True),
            pw_w=0.1 * jax.random.normal(k2, (oup, cin, 1, 1), jnp.float32),
            pw_bn=_bn_params(k3, oup, True),
            c1_w=0.1 * jax.random.normal(k4, (oup, cin, 1, 1), jnp.float32),
            c1_bn=_bn_params(k5, oup, affine),
            cl_w=0.1 * jax.random.normal(k6, (oup, 2 * oup, 1, 1), jnp.float32),
            cl_bn=_bn_params(k7, oup, affine),
        ))
    cc = oup * len(out_strides)
    key, k0, k1, k2, k3 = jax.random.split(key, 5)
    return dict(
        aspps=aspps,
        pre_w=0.1 * jax.random.normal(k0, (cc, cc, 3, 3), jnp.float32),
        pre_bn=_bn_params(k1, cc, affine),
        clf_w=0.1 * jax.random.normal(k2, (in_channel, cc, 3, 3), jnp.float32),
        clf_b=0.1 * jax.random.normal(k3, (in_channel,), jnp.float32),
    )


def pack_kernel_params(raw, spatial_sizes):
    """Fold eval-mode BN and pack all weights/biases for the fused kernel."""
    nb = len(raw["aspps"])
    oup = int(np.asarray(raw["aspps"][0]["pw_w"]).shape[0])
    cc = oup * nb
    ncls = int(np.asarray(raw["clf_w"]).shape[0])
    ncp = max(8, _round_up(ncls, 8))
    h, w = spatial_sizes[0]

    wp_h = w + 4                                   # head pad = 1 (pre_cls) + 1 (clf)
    qclf = _round_up(h * wp_h, 128)
    qpre = _round_up(qclf + 2 * wp_h + 2, 128)
    lin_h = _round_up(qpre + 2 * wp_h + 2, 128)
    # static guards for the extended-domain indexing used by the head
    assert qclf >= (h - 1) * wp_h + w
    assert qpre >= qclf + 2 * wp_h + 2
    assert qpre >= (h + 1) * wp_h + (w + 1) + 1
    assert lin_h >= qpre + 2 * wp_h + 2

    cins = [int(np.asarray(p["dw_w"]).shape[0]) for p in raw["aspps"]]
    rows = _round_up(max([2 * oup, cc, ncp] + cins), 8)

    wmats, fmats = [], []

    def add_w(mat):
        mat = np.asarray(mat, np.float32)
        off = sum(x.shape[1] for x in wmats)
        buf = np.zeros((rows, mat.shape[1]), np.float32)
        buf[:mat.shape[0]] = mat
        wmats.append(buf)
        return off

    def add_f(mat):
        mat = np.asarray(mat, np.float32)
        if mat.ndim == 1:
            mat = mat[:, None]
        off = sum(x.shape[1] for x in fmats)
        buf = np.zeros((rows, mat.shape[1]), np.float32)
        buf[:mat.shape[0]] = mat
        fmats.append(buf)
        return off

    def fold(bn, eps=1e-5):
        g, b = np.asarray(bn["gamma"], np.float64), np.asarray(bn["beta"], np.float64)
        mu, v = np.asarray(bn["mean"], np.float64), np.asarray(bn["var"], np.float64)
        s = g / np.sqrt(v + eps)
        return s, b - mu * s

    branches, rmats = [], []
    for p, (hi, wi) in zip(raw["aspps"], spatial_sizes):
        rate = int(p["rate"])
        dw_w = np.asarray(p["dw_w"], np.float64)
        cin = dw_w.shape[0]
        dw_s, dw_b = fold(p["dw_bn"])
        pw_s, pw_b = fold(p["pw_bn"])
        c1_s, c1_b = fold(p["c1_bn"])
        cl_s, cl_b = fold(p["cl_bn"])

        wbd = np.zeros((2 * oup, 2 * cin), np.float64)   # [[pw, 0], [0, c1]]
        wbd[:oup, :cin] = np.asarray(p["pw_w"], np.float64)[:, :, 0, 0] * pw_s[:, None]
        wbd[oup:, cin:] = np.asarray(p["c1_w"], np.float64)[:, :, 0, 0] * c1_s[:, None]
        wcl = np.asarray(p["cl_w"], np.float64)[:, :, 0, 0] * cl_s[:, None]

        wp_i, hp_i = wi + 2 * rate, hi + 2 * rate
        need = hp_i * wp_i + 2 * rate                    # last flattened tap read + 1
        hp2 = hp_i + 1
        while (hp2 * wp_i) % 128 != 0 or hp2 * wp_i < need:
            hp2 += 1
        resize = (hi, wi) != (h, w)
        branches.append(dict(
            cin=cin, rate=rate, h_i=hi, w_i=wi, wp=wp_i, q=hi * wp_i,
            lin=hp2 * wp_i, extra_rows=hp2 - hp_i, resize=resize,
            c_dw=add_f(dw_w.reshape(cin, 9) * dw_s[:, None]),
            c_bdw=add_f(dw_b), c_b2=add_f(np.concatenate([pw_b, c1_b])),
            c_bcl=add_f(cl_b),
            c_wbd=add_w(wbd), c_wcl=add_w(wcl),
        ))
        if resize:
            rmats.append(jnp.asarray(
                _make_upsample_matrix(hi, wi, wp_i, h, w, wp_h, lin_h),
                jnp.bfloat16))

    pre_s, pre_b = fold(raw["pre_bn"])
    pre_w = np.asarray(raw["pre_w"], np.float64)
    pre_stk = np.concatenate([pre_w[:, :, k // 3, k % 3] for k in range(9)], 1)
    pre_stk = pre_stk * pre_s[:, None]
    clf_w = np.asarray(raw["clf_w"], np.float64)
    clf_stk = np.zeros((ncp, 9 * cc), np.float64)
    clf_stk[:ncls] = np.concatenate([clf_w[:, :, k // 3, k % 3] for k in range(9)], 1)
    clf_b = np.zeros((ncp,), np.float64)
    clf_b[:ncls] = np.asarray(raw["clf_b"], np.float64)

    meta = dict(branches=branches, oup=oup, cc=cc, h=h, w=w, wp_h=wp_h,
                qpre=qpre, qclf=qclf, lin_h=lin_h, ncls=ncls, ncls_pad=ncp,
                c_wpre=add_w(pre_stk), c_wclf=add_w(clf_stk),
                c_bpre=add_f(pre_b), c_bclf=add_f(clf_b))

    # interior mask for the extended pre_cls output plane (row stride wp_h)
    pos = np.arange(qpre)
    rr, ccol = pos // wp_h, pos % wp_h
    mask = (((rr >= 1) & (rr <= h) & (ccol >= 1) & (ccol <= w))
            .astype(np.float32).reshape(1, qpre))

    return dict(meta=meta,
                wpack=jnp.asarray(np.concatenate(wmats, 1), jnp.float32),
                fpack=jnp.asarray(np.concatenate(fmats, 1), jnp.float32),
                mask=jnp.asarray(mask), rmats=rmats)


# ----------------------------------------------------------------------------
# pure-f32 JAX reference of the PyTorch eval forward (for tolerance check only)
# ----------------------------------------------------------------------------
def _conv(x, w, padding=0, dilation=1, groups=1):
    return jax.lax.conv_general_dilated(
        x, w, window_strides=(1, 1),
        padding=((padding, padding), (padding, padding)),
        rhs_dilation=(dilation, dilation),
        dimension_numbers=("NCHW", "OIHW", "NCHW"),
        feature_group_count=groups)


def _bn(x, p, eps=1e-5):
    s = p["gamma"] / jnp.sqrt(p["var"] + eps)
    b = p["beta"] - p["mean"] * s
    return x * s[None, :, None, None] + b[None, :, None, None]


def bilinear_resize_nchw(x, out_h, out_w):
    n, c, h, w = x.shape
    if (h, w) == (out_h, out_w):
        return x

    def src(out_size, in_size):
        scale = in_size / out_size
        coord = (jnp.arange(out_size, dtype=jnp.float32) + 0.5) * scale - 0.5
        coord = jnp.maximum(coord, 0.0)
        i0 = jnp.minimum(jnp.floor(coord).astype(jnp.int32), in_size - 1)
        i1 = jnp.minimum(i0 + 1, in_size - 1)
        return i0, i1, coord - i0.astype(jnp.float32)

    y0, y1, fy = src(out_h, h)
    x0, x1, fx = src(out_w, w)
    fy = fy[None, None, :, None]
    fx = fx[None, None, None, :]
    rows = x[:, :, y0, :] * (1.0 - fy) + x[:, :, y1, :] * fy
    return rows[:, :, :, x0] * (1.0 - fx) + rows[:, :, :, x1] * fx


def reference_forward(xs, raw):
    h0, w0 = xs[0].shape[2], xs[0].shape[3]
    feats = []
    for i, (x, p) in enumerate(zip(xs, raw["aspps"])):
        r = p["rate"]
        d = jax.nn.relu(_bn(_conv(x, p["dw_w"], padding=r, dilation=r,
                                  groups=x.shape[1]), p["dw_bn"]))
        at = jax.nn.relu(_bn(_conv(d, p["pw_w"]), p["pw_bn"]))
        c1 = jax.nn.relu(_bn(_conv(x, p["c1_w"]), p["c1_bn"]))
        y = jax.nn.relu(_bn(_conv(jnp.concatenate([at, c1], 1), p["cl_w"]),
                            p["cl_bn"]))
        if i > 0:
            y = bilinear_resize_nchw(y, h0, w0)
        feats.append(y)
    z = jnp.concatenate(feats, axis=1)
    z = jax.nn.relu(_bn(_conv(z, raw["pre_w"], padding=1), raw["pre_bn"]))
    z = _conv(z, raw["clf_w"], padding=1) + raw["clf_b"][None, :, None, None]
    return jax.nn.sigmoid(z)


# ----------------------------------------------------------------------------
if __name__ == "__main__":
    # cfg: NUM_BLOCKS*FILTER_MULTIPLIER = 8, META_MODE='Scale', AFFINE=True, IN_CHANNEL=3
    out_strides = [4, 8]
    bxf = 8
    in_channel = 3
    batch, h, w = 2, 16, 16

    key = jax.random.PRNGKey(0)
    key, kparam, kx0, kx1 = jax.random.split(key, 4)
    raw = make_raw_params(kparam, out_strides, bxf, in_channel,
                          meta_mode="Scale", affine=True)

    # one NCHW feature map per output stride (PyTorch layout)
    c0 = bxf * out_strides[0] // 4        # 8 channels  @ 16x16
    c1 = bxf * out_strides[1] // 4        # 16 channels @ 8x8
    x0 = jax.random.normal(kx0, (batch, c0, h, w), jnp.float32)
    x1 = jax.random.normal(kx1, (batch, c1, h // 2, w // 2), jnp.float32)

    kp = pack_kernel_params(raw, spatial_sizes=[(h, w), (h // 2, w // 2)])

    fwd = jax.jit(lambda a, b: decoder_forward([a, b], kp))
    pred = jax.block_until_ready(fwd(x0, x1))

    assert pred.shape == (batch, in_channel, h, w), pred.shape
    assert bool(jnp.all(jnp.isfinite(pred)))
    assert bool(jnp.all((pred >= 0.0) & (pred <= 1.0)))   # sigmoid output

    # tolerance check against a pure-f32 JAX reference of the PyTorch forward
    ref = jax.block_until_ready(
        jax.jit(lambda a, b: reference_forward([a, b], raw))(x0, x1))
    err = float(jnp.max(jnp.abs(pred - ref)))
    assert err < 2e-2, f"max abs error vs f32 reference: {err}"

    print("KERNEL_OK")
</pallas_src>

<mosaic_0001>
module attributes {stable_mosaic.version = 11 : i64} {
  func.func @_decoder_kernel(%arg0: i32, %arg1: memref<1x8x1152xf32, #tpu.memory_space<vmem>>, %arg2: memref<1x16x384xf32, #tpu.memory_space<vmem>>, %arg3: memref<16x26xf32, #tpu.memory_space<vmem>>, %arg4: memref<16x368xf32, #tpu.memory_space<vmem>>, %arg5: memref<1x512xf32, #tpu.memory_space<vmem>>, %arg6: memref<128x640xbf16, #tpu.memory_space<vmem>>, %arg7: memref<1x8x384xf32, #tpu.memory_space<vmem>>, %arg8: memref<16x640xf32, #tpu.memory_space<vmem>>) attributes {dimension_semantics = [#tpu.dimension_semantics<parallel>], iteration_bounds = array<i64: 2>, scalar_prefetch = 0 : i64, scratch_operands = 1 : i64, tpu.core_type = #tpu.core_type<tc>, window_params = [{transform_indices = @transform_0, window_bounds = array<i64: 1, 8, 1152>}, {transform_indices = @transform_1, window_bounds = array<i64: 1, 16, 384>}, {pipeline_mode = #tpu.pipeline_mode<synchronous>, transform_indices = @transform_2, window_bounds = array<i64: 16, 26>}, {pipeline_mode = #tpu.pipeline_mode<synchronous>, transform_indices = @transform_3, window_bounds = array<i64: 16, 368>}, {pipeline_mode = #tpu.pipeline_mode<synchronous>, transform_indices = @transform_4, window_bounds = array<i64: 1, 512>}, {pipeline_mode = #tpu.pipeline_mode<synchronous>, transform_indices = @transform_5, window_bounds = array<i64: 128, 640>}, {transform_indices = @transform_6, window_bounds = array<i64: 1, 8, 384>}]} {
    %cst = arith.constant 0.000000e+00 : f32
    %0 = vector.broadcast %cst : f32 to vector<16x640xf32>
    %c0 = arith.constant 0 : index
    %c0_0 = arith.constant 0 : index
    %1 = vector.load %arg8[%c0, %c0_0] : memref<16x640xf32, #tpu.memory_space<vmem>>, vector<16x640xf32>
    tpu.vector_store %arg8[%c0, %c0_0], %0 {strides = array<i32>} : memref<16x640xf32, #tpu.memory_space<vmem>>, vector<16x640xf32>,
    %c0_1 = arith.constant 0 : index
    %c0_2 = arith.constant 0 : index
    %2 = vector.load %arg3[%c0_1, %c0_2] : memref<16x26xf32, #tpu.memory_space<vmem>>, vector<8x9xf32>
    %c0_3 = arith.constant 0 : index
    %c0_4 = arith.constant 0 : index
    %c0_5 = arith.constant 0 : index
    %3 = vector.load %arg1[%c0_3, %c0_4, %c0_5] : memref<1x8x1152xf32, #tpu.memory_space<vmem>>, vector<1x8x512xf32>
    %4 = vector.shape_cast %3 : vector<1x8x512xf32> to vector<8x512xf32>
    %5 = vector.extract_strided_slice %2 {offsets = [0, 0], sizes = [8, 1], strides = [1, 1]} : vector<8x9xf32> to vector<8x1xf32>
    %6 = vector.broadcast %5 : vector<8x1xf32> to vector<8x512xf32>
    %7 = arith.mulf %4, %6 : vector<8x512xf32>
    %c0_6 = arith.constant 0 : index
    %c0_7 = arith.constant 0 : index
    %c8 = arith.constant 8 : index
    %8 = vector.load %arg1[%c0_6, %c0_7, %c8] : memref<1x8x1152xf32, #tpu.memory_space<vmem>>, vector<1x8x512xf32>
    %9 = vector.shape_cast %8 : vector<1x8x512xf32> to vector<8x512xf32>
    %10 = vector.extract_strided_slice %2 {offsets = [0, 1], sizes = [8, 1], strides = [1, 1]} : vector<8x9xf32> to vector<8x1xf32>
    %11 = vector.broadcast %10 : vector<8x1xf32> to vector<8x512xf32>
    %12 = arith.mulf %9, %11 : vector<8x512xf32>
    %c0_8 = arith.constant 0 : index
    %c0_9 = arith.constant 0 : index
    %c16 = arith.constant 16 : index
    %13 = vector.load %arg1[%c0_8, %c0_9, %c16] : memref<1x8x1152xf32, #tpu.memory_space<vmem>>, vector<1x8x512xf32>
    %14 = vector.shape_cast %13 : vector<1x8x512xf32> to vector<8x512xf32>
    %15 = vector.extract_strided_slice %2 {offsets = [0, 2], sizes = [8, 1], strides = [1, 1]} : vector<8x9xf32> to vector<8x1xf32>
    %16 = vector.broadcast %15 : vector<8x1xf32> to vector<8x512xf32>
    %17 = arith.mulf %14, %16 : vector<8x512xf32>
    %c0_10 = arith.constant 0 : index
    %c0_11 = arith.constant 0 : index
    %c256 = arith.constant 256 : index
    %18 = vector.load %arg1[%c0_10, %c0_11, %c256] : memref<1x8x1152xf32, #tpu.memory_space<vmem>>, vector<1x8x512xf32>
    %19 = vector.shape_cast %18 : vector<1x8x512xf32> to vector<8x512xf32>
    %20 = vector.extract_strided_slice %2 {offsets = [0, 3], sizes = [8, 1], strides = [1, 1]} : vector<8x9xf32> to vector<8x1xf32>
    %21 = vector.broadcast %20 : vector<8x1xf32> to vector<8x512xf32>
    %22 = arith.mulf %19, %21 : vector<8x512xf32>
    %c0_12 = arith.constant 0 : index
    %c0_13 = arith.constant 0 : index
    %c264 = arith.constant 264 : index
    %23 = vector.load %arg1[%c0_12, %c0_13, %c264] : memref<1x8x1152xf32, #tpu.memory_space<vmem>>, vector<1x8x512xf32>
    %24 = vector.shape_cast %23 : vector<1x8x512xf32> to vector<8x512xf32>
    %25 = vector.extract_strided_slice %2 {offsets = [0, 4], sizes = [8, 1], strides = [1, 1]} : vector<8x9xf32> to vector<8x1xf32>
    %26 = vector.broadcast %25 : vector<8x1xf32> to vector<8x512xf32>
    %27 = arith.mulf %24, %26 : vector<8x512xf32>
    %c0_14 = arith.constant 0 : index
    %c0_15 = arith.constant 0 : index
    %c272 = arith.constant 272 : index
    %28 = vector.load %arg1[%c0_14, %c0_15, %c272] : memref<1x8x1152xf32, #tpu.memory_space<vmem>>, vector<1x8x512xf32>
    %29 = vector.shape_cast %28 : vector<1x8x512xf32> to vector<8x512xf32>
    %30 = vector.extract_strided_slice %2 {offsets = [0, 5], sizes = [8, 1], strides = [1, 1]} : vector<8x9xf32> to vector<8x1xf32>
    %31 = vector.broadcast %30 : vector<8x1xf32> to vector<8x512xf32>
    %32 = arith.mulf %29, %31 : vector<8x512xf32>
    %c0_16 = arith.constant 0 : index
    %c0_17 = arith.constant 0 : index
    %c512 = arith.constant 512 : index
    %33 = vector.load %arg1[%c0_16, %c0_17, %c512] : memref<1x8x1152xf32, #tpu.memory_space<vmem>>, vector<1x8x512xf32>
    %34 = vector.shape_cast %33 : vector<1x8x512xf32> to vector<8x512xf32>
    %35 = vector.extract_strided_slice %2 {offsets = [0, 6], sizes = [8, 1], strides = [1, 1]} : vector<8x9xf32> to vector<8x1xf32>
    %36 = vector.broadcast %35 : vector<8x1xf32> to vector<8x512xf32>
    %37 = arith.mulf %34, %36 : vector<8x512xf32>
    %c0_18 = arith.constant 0 : index
    %c0_19 = arith.constant 0 : index
    %c520 = arith.constant 520 : index
    %38 = vector.load %arg1[%c0_18, %c0_19, %c520] : memref<1x8x1152xf32, #tpu.memory_space<vmem>>, vector<1x8x512xf32>
    %39 = vector.shape_cast %38 : vector<1x8x512xf32> to vector<8x512xf32>
    %40 = vector.extract_strided_slice %2 {offsets = [0, 7], sizes = [8, 1], strides = [1, 1]} : vector<8x9xf32> to vector<8x1xf32>
    %41 = vector.broadcast %40 : vector<8x1xf32> to vector<8x512xf32>
    %42 = arith.mulf %39, %41 : vector<8x512xf32>
    %c0_20 = arith.constant 0 : index
    %c0_21 = arith.constant 0 : index
    %c528 = arith.constant 528 : index
    %43 = vector.load %arg1[%c0_20, %c0_21, %c528] : memref<1x8x1152xf32, #tpu.memory_space<vmem>>, vector<1x8x512xf32>
    %44 = vector.shape_cast %43 : vector<1x8x512xf32> to vector<8x512xf32>
    %45 = vector.extract_strided_slice %2 {offsets = [0, 8], sizes = [8, 1], strides = [1, 1]} : vector<8x9xf32> to vector<8x1xf32>
    %46 = vector.broadcast %45 : vector<8x1xf32> to vector<8x512xf32>
    %47 = arith.mulf %44, %46 : vector<8x512xf32>
    %48 = arith.addf %7, %12 : vector<8x512xf32>
    %49 = arith.addf %17, %22 : vector<8x512xf32>
    %50 = arith.addf %27, %32 : vector<8x512xf32>
    %51 = arith.addf %37, %42 : vector<8x512xf32>
    %52 = arith.addf %48, %49 : vector<8x512xf32>
    %53 = arith.addf %50, %51 : vector<8x512xf32>
    %54 = arith.addf %52, %53 : vector<8x512xf32>
    %55 = arith.addf %54, %47 : vector<8x512xf32>
    %c0_22 = arith.constant 0 : index
    %c9 = arith.constant 9 : index
    %56 = vector.load %arg3[%c0_22, %c9] : memref<16x26xf32, #tpu.memory_space<vmem>>, vector<8x1xf32>
    %57 = vector.broadcast %56 : vector<8x1xf32> to vector<8x512xf32>
    %58 = arith.addf %55, %57 : vector<8x512xf32>
    %cst_23 = arith.constant 0.000000e+00 : f32
    %59 = vector.broadcast %cst_23 : f32 to vector<8x512xf32>
    %60 = arith.maximumf %58, %59 : vector<8x512xf32>
    %c0_24 = arith.constant 0 : index
    %c0_25 = arith.constant 0 : index
    %c264_26 = arith.constant 264 : index
    %61 = vector.load %arg1[%c0_24, %c0_25, %c264_26] : memref<1x8x1152xf32, #tpu.memory_space<vmem>>, vector<1x8x512xf32>
    %62 = vector.shape_cast %61 : vector<1x8x512xf32> to vector<8x512xf32>
    %63 = tpu.concatenate %60, %62 in 0 : vector<8x512xf32>, vector<8x512xf32> -> vector<16x512xf32>
    %64 = arith.truncf %63 : vector<16x512xf32> to vector<16x512xbf16>
    %c0_27 = arith.constant 0 : index
    %c0_28 = arith.constant 0 : index
    %65 = vector.load %arg4[%c0_27, %c0_28] : memref<16x368xf32, #tpu.memory_space<vmem>>, vector<16x16xf32>
    %66 = arith.truncf %65 : vector<16x16xf32> to vector<16x16xbf16>
    %cst_29 = arith.constant dense<0.000000e+00> : vector<16x512xf32>
    %67 = tpu.matmul %66, %64, %cst_29 {dimension_numbers = #tpu.dot_dimension_numbers<[1], [0], [0], [1], [0, 0, 1, 1], [], []>} : vector<16x16xbf16>, vector<16x512xbf16>, vector<16x512xf32> -> vector<16x512xf32>
    %c0_30 = arith.constant 0 : index
    %c10 = arith.constant 10 : index
    %68 = vector.load %arg3[%c0_30, %c10] : memref<16x26xf32, #tpu.memory_space<vmem>>, vector<16x1xf32>
    %69 = vector.broadcast %68 : vector<16x1xf32> to vector<16x512xf32>
    %70 = arith.addf %67, %69 : vector<16x512xf32>
    %cst_31 = arith.constant 0.000000e+00 : f32
    %71 = vector.broadcast %cst_31 : f32 to vector<16x512xf32>
    %72 = arith.maximumf %70, %71 : vector<16x512xf32>
    %c0_32 = arith.constant 0 : index
    %c16_33 = arith.constant 16 : index
    %73 = vector.load %arg4[%c0_32, %c16_33] : memref<16x368xf32, #tpu.memory_space<vmem>>, vector<8x16xf32>
    %74 = arith.truncf %73 : vector<8x16xf32> to vector<8x16xbf16>
    %75 = arith.truncf %72 : vector<16x512xf32> to vector<16x512xbf16>
    %cst_34 = arith.constant dense<0.000000e+00> : vector<8x512xf32>
    %76 = tpu.matmul %74, %75, %cst_34 {dimension_numbers = #tpu.dot_dimension_numbers<[1], [0], [0], [1], [0, 0, 1, 1], [], []>} : vector<8x16xbf16>, vector<16x512xbf16>, vector<8x512xf32> -> vector<8x512xf32>
    %c0_35 = arith.constant 0 : index
    %c11 = arith.constant 11 : index
    %77 = vector.load %arg3[%c0_35, %c11] : memref<16x26xf32, #tpu.memory_space<vmem>>, vector<8x1xf32>
    %78 = vector.broadcast %77 : vector<8x1xf32> to vector<8x512xf32>
    %79 = arith.addf %76, %78 : vector<8x512xf32>
    %cst_36 = arith.constant 0.000000e+00 : f32
    %80 = vector.broadcast %cst_36 : f32 to vector<8x512xf32>
    %81 = arith.maximumf %79, %80 : vector<8x512xf32>
    %82 = vector.extract_strided_slice %81 {offsets = [0, 0], sizes = [8, 16], strides = [1, 1]} : vector<8x512xf32> to vector<8x16xf32>
    %c0_37 = arith.constant 0 : index
    %c42 = arith.constant 42 : index
    %83 = vector.load %arg8[%c0_37, %c42] : memref<16x640xf32, #tpu.memory_space<vmem>>, vector<8x16xf32>
    tpu.vector_store %arg8[%c0_37, %c42], %82 {strides = array<i32>} : memref<16x640xf32, #tpu.memory_space<vmem>>, vector<8x16xf32>,
    %84 = vector.extract_strided_slice %81 {offsets = [0, 32], sizes = [8, 16], strides = [1, 1]} : vector<8x512xf32> to vector<8x16xf32>
    %c0_38 = arith.constant 0 : index
    %c62 = arith.constant 62 : index
    %85 = vector.load %arg8[%c0_38, %c62] : memref<16x640xf32, #tpu.memory_space<vmem>>, vector<8x16xf32>
    tpu.vector_store %arg8[%c0_38, %c62], %84 {strides = array<i32>} : memref<16x640xf32, #tpu.memory_space<vmem>>, vector<8x16xf32>,
    %86 = vector.extract_strided_slice %81 {offsets = [0, 64], sizes = [8, 16], strides = [1, 1]} : vector<8x512xf32> to vector<8x16xf32>
    %c0_39 = arith.constant 0 : index
    %c82 = arith.constant 82 : index
    %87 = vector.load %arg8[%c0_39, %c82] : memref<16x640xf32, #tpu.memory_space<vmem>>, vector<8x16xf32>
    tpu.vector_store %arg8[%c0_39, %c82], %86 {strides = array<i32>} : memref<16x640xf32, #tpu.memory_space<vmem>>, vector<8x16xf32>,
    %88 = vector.extract_strided_slice %81 {offsets = [0, 96], sizes = [8, 16], strides = [1, 1]} : vector<8x512xf32> to vector<8x16xf32>
    %c0_40 = arith.constant 0 : index
    %c102 = arith.constant 102 : index
    %89 = vector.load %arg8[%c0_40, %c102] : memref<16x640xf32, #tpu.memory_space<vmem>>, vector<8x16xf32>
    tpu.vector_store %arg8[%c0_40, %c102], %88 {strides = array<i32>} : memref<16x640xf32, #tpu.memory_space<vmem>>, vector<8x16xf32>,
    %90 = vector.extract_strided_slice %81 {offsets = [0, 128], sizes = [8, 16], strides = [1, 1]} : vector<8x512xf32> to vector<8x16xf32>
    %c0_41 = arith.constant 0 : index
    %c122 = arith.constant 122 : index
    %91 = vector.load %arg8[%c0_41, %c122] : memref<16x640xf32, #tpu.memory_space<vmem>>, vector<8x16xf32>
    tpu.vector_store %arg8[%c0_41, %c122], %90 {strides = array<i32>} : memref<16x640xf32, #tpu.memory_space<vmem>>, vector<8x16xf32>,
    %92 = vector.extract_strided_slice %81 {offsets = [0, 160], sizes = [8, 16], strides = [1, 1]} : vector<8x512xf32> to vector<8x16xf32>
    %c0_42 = arith.constant 0 : index
    %c142 = arith.constant 142 : index
    %93 = vector.load %arg8[%c0_42, %c142] : memref<16x640xf32, #tpu.memory_space<vmem>>, vector<8x16xf32>
    tpu.vector_store %arg8[%c0_42, %c142], %92 {strides = array<i32>} : memref<16x640xf32, #tpu.memory_space<vmem>>, vector<8x16xf32>,
    %94 = vector.extract_strided_slice %81 {offsets = [0, 192], sizes = [8, 16], strides = [1, 1]} : vector<8x512xf32> to vector<8x16xf32>
    %c0_43 = arith.constant 0 : index
    %c162 = arith.constant 162 : index
    %95 = vector.load %arg8[%c0_43, %c162] : memref<16x640xf32, #tpu.memory_space<vmem>>, vector<8x16xf32>
    tpu.vector_store %arg8[%c0_43, %c162], %94 {strides = array<i32>} : memref<16x640xf32, #tpu.memory_space<vmem>>, vector<8x16xf32>,
    %96 = vector.extract_strided_slice %81 {offsets = [0, 224], sizes = [8, 16], strides = [1, 1]} : vector<8x512xf32> to vector<8x16xf32>
    %c0_44 = arith.constant 0 : index
    %c182 = arith.constant 182 : index
    %97 = vector.load %arg8[%c0_44, %c182] : memref<16x640xf32, #tpu.memory_space<vmem>>, vector<8x16xf32>
    tpu.vector_store %arg8[%c0_44, %c182], %96 {strides = array<i32>} : memref<16x640xf32, #tpu.memory_space<vmem>>, vector<8x16xf32>,
    %98 = vector.extract_strided_slice %81 {offsets = [0, 256], sizes = [8, 16], strides = [1, 1]} : vector<8x512xf32> to vector<8x16xf32>
    %c0_45 = arith.constant 0 : index
    %c202 = arith.constant 202 : index
    %99 = vector.load %arg8[%c0_45, %c202] : memref<16x640xf32, #tpu.memory_space<vmem>>, vector<8x16xf32>
    tpu.vector_store %arg8[%c0_45, %c202], %98 {strides = array<i32>} : memref<16x640xf32, #tpu.memory_space<vmem>>, vector<8x16xf32>,
    %100 = vector.extract_strided_slice %81 {offsets = [0, 288], sizes = [8, 16], strides = [1, 1]} : vector<8x512xf32> to vector<8x16xf32>
    %c0_46 = arith.constant 0 : index
    %c222 = arith.constant 222 : index
    %101 = vector.load %arg8[%c0_46, %c222] : memref<16x640xf32, #tpu.memory_space<vmem>>, vector<8x16xf32>
    tpu.vector_store %arg8[%c0_46, %c222], %100 {strides = array<i32>} : memref<16x640xf32, #tpu.memory_space<vmem>>, vector<8x16xf32>,
    %102 = vector.extract_strided_slice %81 {offsets = [0, 320], sizes = [8, 16], strides = [1, 1]} : vector<8x512xf32> to vector<8x16xf32>
    %c0_47 = arith.constant 0 : index
    %c242 = arith.constant 242 : index
    %103 = vector.load %arg8[%c0_47, %c242] : memref<16x640xf32, #tpu.memory_space<vmem>>, vector<8x16xf32>
    tpu.vector_store %arg8[%c0_47, %c242], %102 {strides = array<i32>} : memref<16x640xf32, #tpu.memory_space<vmem>>, vector<8x16xf32>,
    %104 = vector.extract_strided_slice %81 {offsets = [0, 352], sizes = [8, 16], strides = [1, 1]} : vector<8x512xf32> to vector<8x16xf32>
    %c0_48 = arith.constant 0 : index
    %c262 = arith.constant 262 : index
    %105 = vector.load %arg8[%c0_48, %c262] : memref<16x640xf32, #tpu.memory_space<vmem>>, vector<8x16xf32>
    tpu.vector_store %arg8[%c0_48, %c262], %104 {strides = array<i32>} : memref<16x640xf32, #tpu.memory_space<vmem>>, vector<8x16xf32>,
    %106 = vector.extract_strided_slice %81 {offsets = [0, 384], sizes = [8, 16], strides = [1, 1]} : vector<8x512xf32> to vector<8x16xf32>
    %c0_49 = arith.constant 0 : index
    %c282 = arith.constant 282 : index
    %107 = vector.load %arg8[%c0_49, %c282] : memref<16x640xf32, #tpu.memory_space<vmem>>, vector<8x16xf32>
    tpu.vector_store %arg8[%c0_49, %c282], %106 {strides = array<i32>} : memref<16x640xf32, #tpu.memory_space<vmem>>, vector<8x16xf32>,
    %108 = vector.extract_strided_slice %81 {offsets = [0, 416], sizes = [8, 16], strides = [1, 1]} : vector<8x512xf32> to vector<8x16xf32>
    %c0_50 = arith.constant 0 : index
    %c302 = arith.constant 302 : index
    %109 = vector.load %arg8[%c0_50, %c302] : memref<16x640xf32, #tpu.memory_space<vmem>>, vector<8x16xf32>
    tpu.vector_store %arg8[%c0_50, %c302], %108 {strides = array<i32>} : memref<16x640xf32, #tpu.memory_space<vmem>>, vector<8x16xf32>,
    %110 = vector.extract_strided_slice %81 {offsets = [0, 448], sizes = [8, 16], strides = [1, 1]} : vector<8x512xf32> to vector<8x16xf32>
    %c0_51 = arith.constant 0 : index
    %c322 = arith.constant 322 : index
    %111 = vector.load %arg8[%c0_51, %c322] : memref<16x640xf32, #tpu.memory_space<vmem>>, vector<8x16xf32>
    tpu.vector_store %arg8[%c0_51, %c322], %110 {strides = array<i32>} : memref<16x640xf32, #tpu.memory_space<vmem>>, vector<8x16xf32>,
    %112 = vector.extract_strided_slice %81 {offsets = [0, 480], sizes = [8, 16], strides = [1, 1]} : vector<8x512xf32> to vector<8x16xf32>
    %c0_52 = arith.constant 0 : index
    %c342 = arith.constant 342 : index
    %113 = vector.load %arg8[%c0_52, %c342] : memref<16x640xf32, #tpu.memory_space<vmem>>, vector<8x16xf32>
    tpu.vector_store %arg8[%c0_52, %c342], %112 {strides = array<i32>} : memref<16x640xf32, #tpu.memory_space<vmem>>, vector<8x16xf32>,
    %c0_53 = arith.constant 0 : index
    %c12 = arith.constant 12 : index
    %114 = vector.load %arg3[%c0_53, %c12] : memref<16x26xf32, #tpu.memory_space<vmem>>, vector<16x9xf32>
    %c0_54 = arith.constant 0 : index
    %c0_55 = arith.constant 0 : index
    %c0_56 = arith.constant 0 : index
    %115 = vector.load %arg2[%c0_54, %c0_55, %c0_56] : memref<1x16x384xf32, #tpu.memory_space<vmem>>, vector<1x16x128xf32>
    %116 = vector.shape_cast %115 : vector<1x16x128xf32> to vector<16x128xf32>
    %117 = vector.extract_strided_slice %114 {offsets = [0, 0], sizes = [16, 1], strides = [1, 1]} : vector<16x9xf32> to vector<16x1xf32>
    %118 = vector.broadcast %117 : vector<16x1xf32> to vector<16x128xf32>
    %119 = arith.mulf %116, %118 : vector<16x128xf32>
    %c0_57 = arith.constant 0 : index
    %c0_58 = arith.constant 0 : index
    %c4 = arith.constant 4 : index
    %120 = vector.load %arg2[%c0_57, %c0_58, %c4] : memref<1x16x384xf32, #tpu.memory_space<vmem>>, vector<1x16x128xf32>
    %121 = vector.shape_cast %120 : vector<1x16x128xf32> to vector<16x128xf32>
    %122 = vector.extract_strided_slice %114 {offsets = [0, 1], sizes = [16, 1], strides = [1, 1]} : vector<16x9xf32> to vector<16x1xf32>
    %123 = vector.broadcast %122 : vector<16x1xf32> to vector<16x128xf32>
    %124 = arith.mulf %121, %123 : vector<16x128xf32>
    %c0_59 = arith.constant 0 : index
    %c0_60 = arith.constant 0 : index
    %c8_61 = arith.constant 8 : index
    %125 = vector.load %arg2[%c0_59, %c0_60, %c8_61] : memref<1x16x384xf32, #tpu.memory_space<vmem>>, vector<1x16x128xf32>
    %126 = vector.shape_cast %125 : vector<1x16x128xf32> to vector<16x128xf32>
    %127 = vector.extract_strided_slice %114 {offsets = [0, 2], sizes = [16, 1], strides = [1, 1]} : vector<16x9xf32> to vector<16x1xf32>
    %128 = vector.broadcast %127 : vector<16x1xf32> to vector<16x128xf32>
    %129 = arith.mulf %126, %128 : vector<16x128xf32>
    %c0_62 = arith.constant 0 : index
    %c0_63 = arith.constant 0 : index
    %c64 = arith.constant 64 : index
    %130 = vector.load %arg2[%c0_62, %c0_63, %c64] : memref<1x16x384xf32, #tpu.memory_space<vmem>>, vector<1x16x128xf32>
    %131 = vector.shape_cast %130 : vector<1x16x128xf32> to vector<16x128xf32>
    %132 = vector.extract_strided_slice %114 {offsets = [0, 3], sizes = [16, 1], strides = [1, 1]} : vector<16x9xf32> to vector<16x1xf32>
    %133 = vector.broadcast %132 : vector<16x1xf32> to vector<16x128xf32>
    %134 = arith.mulf %131, %133 : vector<16x128xf32>
    %c0_64 = arith.constant 0 : index
    %c0_65 = arith.constant 0 : index
    %c68 = arith.constant 68 : index
    %135 = vector.load %arg2[%c0_64, %c0_65, %c68] : memref<1x16x384xf32, #tpu.memory_space<vmem>>, vector<1x16x128xf32>
    %136 = vector.shape_cast %135 : vector<1x16x128xf32> to vector<16x128xf32>
    %137 = vector.extract_strided_slice %114 {offsets = [0, 4], sizes = [16, 1], strides = [1, 1]} : vector<16x9xf32> to vector<16x1xf32>
    %138 = vector.broadcast %137 : vector<16x1xf32> to vector<16x128xf32>
    %139 = arith.mulf %136, %138 : vector<16x128xf32>
    %c0_66 = arith.constant 0 : index
    %c0_67 = arith.constant 0 : index
    %c72 = arith.constant 72 : index
    %140 = vector.load %arg2[%c0_66, %c0_67, %c72] : memref<1x16x384xf32, #tpu.memory_space<vmem>>, vector<1x16x128xf32>
    %141 = vector.shape_cast %140 : vector<1x16x128xf32> to vector<16x128xf32>
    %142 = vector.extract_strided_slice %114 {offsets = [0, 5], sizes = [16, 1], strides = [1, 1]} : vector<16x9xf32> to vector<16x1xf32>
    %143 = vector.broadcast %142 : vector<16x1xf32> to vector<16x128xf32>
    %144 = arith.mulf %141, %143 : vector<16x128xf32>
    %c0_68 = arith.constant 0 : index
    %c0_69 = arith.constant 0 : index
    %c128 = arith.constant 128 : index
    %145 = vector.load %arg2[%c0_68, %c0_69, %c128] : memref<1x16x384xf32, #tpu.memory_space<vmem>>, vector<1x16x128xf32>
    %146 = vector.shape_cast %145 : vector<1x16x128xf32> to vector<16x128xf32>
    %147 = vector.extract_strided_slice %114 {offsets = [0, 6], sizes = [16, 1], strides = [1, 1]} : vector<16x9xf32> to vector<16x1xf32>
    %148 = vector.broadcast %147 : vector<16x1xf32> to vector<16x128xf32>
    %149 = arith.mulf %146, %148 : vector<16x128xf32>
    %c0_70 = arith.constant 0 : index
    %c0_71 = arith.constant 0 : index
    %c132 = arith.constant 132 : index
    %150 = vector.load %arg2[%c0_70, %c0_71, %c132] : memref<1x16x384xf32, #tpu.memory_space<vmem>>, vector<1x16x128xf32>
    %151 = vector.shape_cast %150 : vector<1x16x128xf32> to vector<16x128xf32>
    %152 = vector.extract_strided_slice %114 {offsets = [0, 7], sizes = [16, 1], strides = [1, 1]} : vector<16x9xf32> to vector<16x1xf32>
    %153 = vector.broadcast %152 : vector<16x1xf32> to vector<16x128xf32>
    %154 = arith.mulf %151, %153 : vector<16x128xf32>
    %c0_72 = arith.constant 0 : index
    %c0_73 = arith.constant 0 : index
    %c136 = arith.constant 136 : index
    %155 = vector.load %arg2[%c0_72, %c0_73, %c136] : memref<1x16x384xf32, #tpu.memory_space<vmem>>, vector<1x16x128xf32>
    %156 = vector.shape_cast %155 : vector<1x16x128xf32> to vector<16x128xf32>
    %157 = vector.extract_strided_slice %114 {offsets = [0, 8], sizes = [16, 1], strides = [1, 1]} : vector<16x9xf32> to vector<16x1xf32>
    %158 = vector.broadcast %157 : vector<16x1xf32> to vector<16x128xf32>
    %159 = arith.mulf %156, %158 : vector<16x128xf32>
    %160 = arith.addf %119, %124 : vector<16x128xf32>
    %161 = arith.addf %129, %134 : vector<16x128xf32>
    %162 = arith.addf %139, %144 : vector<16x128xf32>
    %163 = arith.addf %149, %154 : vector<16x128xf32>
    %164 = arith.addf %160, %161 : vector<16x128xf32>
    %165 = arith.addf %162, %163 : vector<16x128xf32>
    %166 = arith.addf %164, %165 : vector<16x128xf32>
    %167 = arith.addf %166, %159 : vector<16x128xf32>
    %c0_74 = arith.constant 0 : index
    %c21 = arith.constant 21 : index
    %168 = vector.load %arg3[%c0_74, %c21] : memref<16x26xf32, #tpu.memory_space<vmem>>, vector<16x1xf32>
    %169 = vector.broadcast %168 : vector<16x1xf32> to vector<16x128xf32>
    %170 = arith.addf %167, %169 : vector<16x128xf32>
    %cst_75 = arith.constant 0.000000e+00 : f32
    %171 = vector.broadcast %cst_75 : f32 to vector<16x128xf32>
    %172 = arith.maximumf %170, %171 : vector<16x128xf32>
    %c0_76 = arith.constant 0 : index
    %c0_77 = arith.constant 0 : index
    %c68_78 = arith.constant 68 : index
    %173 = vector.load %arg2[%c0_76, %c0_77, %c68_78] : memref<1x16x384xf32, #tpu.memory_space<vmem>>, vector<1x16x128xf32>
    %174 = vector.shape_cast %173 : vector<1x16x128xf32> to vector<16x128xf32>
    %175 = tpu.concatenate %172, %174 in 0 : vector<16x128xf32>, vector<16x128xf32> -> vector<32x128xf32>
    %176 = arith.truncf %175 : vector<32x128xf32> to vector<32x128xbf16>
    %c0_79 = arith.constant 0 : index
    %c32 = arith.constant 32 : index
    %177 = vector.load %arg4[%c0_79, %c32] : memref<16x368xf32, #tpu.memory_space<vmem>>, vector<16x32xf32>
    %178 = arith.truncf %177 : vector<16x32xf32> to vector<16x32xbf16>
    %cst_80 = arith.constant dense<0.000000e+00> : vector<16x128xf32>
    %179 = tpu.matmul %178, %176, %cst_80 {dimension_numbers = #tpu.dot_dimension_numbers<[1], [0], [0], [1], [0, 0, 1, 1], [], []>} : vector<16x32xbf16>, vector<32x128xbf16>, vector<16x128xf32> -> vector<16x128xf32>
    %c0_81 = arith.constant 0 : index
    %c22 = arith.constant 22 : index
    %180 = vector.load %arg3[%c0_81, %c22] : memref<16x26xf32, #tpu.memory_space<vmem>>, vector<16x1xf32>
    %181 = vector.broadcast %180 : vector<16x1xf32> to vector<16x128xf32>
    %182 = arith.addf %179, %181 : vector<16x128xf32>
    %cst_82 = arith.constant 0.000000e+00 : f32
    %183 = vector.broadcast %cst_82 : f32 to vector<16x128xf32>
    %184 = arith.maximumf %182, %183 : vector<16x128xf32>
    %c0_83 = arith.constant 0 : index
    %c64_84 = arith.constant 64 : index
    %185 = vector.load %arg4[%c0_83, %c64_84] : memref<16x368xf32, #tpu.memory_space<vmem>>, vector<8x16xf32>
    %186 = arith.truncf %185 : vector<8x16xf32> to vector<8x16xbf16>
    %187 = arith.truncf %184 : vector<16x128xf32> to vector<16x128xbf16>
    %cst_85 = arith.constant dense<0.000000e+00> : vector<8x128xf32>
    %188 = tpu.matmul %186, %187, %cst_85 {dimension_numbers = #tpu.dot_dimension_numbers<[1], [0], [0], [1], [0, 0, 1, 1], [], []>} : vector<8x16xbf16>, vector<16x128xbf16>, vector<8x128xf32> -> vector<8x128xf32>
    %c0_86 = arith.constant 0 : index
    %c23 = arith.constant 23 : index
    %189 = vector.load %arg3[%c0_86, %c23] : memref<16x26xf32, #tpu.memory_space<vmem>>, vector<8x1xf32>
    %190 = vector.broadcast %189 : vector<8x1xf32> to vector<8x128xf32>
    %191 = arith.addf %188, %190 : vector<8x128xf32>
    %cst_87 = arith.constant 0.000000e+00 : f32
    %192 = vector.broadcast %cst_87 : f32 to vector<8x128xf32>
    %193 = arith.maximumf %191, %192 : vector<8x128xf32>
    %194 = arith.truncf %193 : vector<8x128xf32> to vector<8x128xbf16>
    %c0_88 = arith.constant 0 : index
    %c0_89 = arith.constant 0 : index
    %195 = vector.load %arg6[%c0_88, %c0_89] : memref<128x640xbf16, #tpu.memory_space<vmem>>, vector<128x640xbf16>
    %cst_90 = arith.constant dense<0.000000e+00> : vector<8x640xf32>
    %196 = tpu.matmul %194, %195, %cst_90 {dimension_numbers = #tpu.dot_dimension_numbers<[1], [0], [0], [1], [0, 0, 1, 1], [], []>} : vector<8x128xbf16>, vector<128x640xbf16>, vector<8x640xf32> -> vector<8x640xf32>
    %c8_91 = arith.constant 8 : index
    %c0_92 = arith.constant 0 : index
    %197 = vector.load %arg8[%c8_91, %c0_92] : memref<16x640xf32, #tpu.memory_space<vmem>>, vector<8x640xf32>
    tpu.vector_store %arg8[%c8_91, %c0_92], %196 {strides = array<i32>} : memref<16x640xf32, #tpu.memory_space<vmem>>, vector<8x640xf32>,
    %c0_93 = arith.constant 0 : index
    %c0_94 = arith.constant 0 : index
    %198 = vector.load %arg8[%c0_93, %c0_94] : memref<16x640xf32, #tpu.memory_space<vmem>>, vector<16x512xf32>
    %199 = arith.truncf %198 : vector<16x512xf32> to vector<16x512xbf16>
    %c0_95 = arith.constant 0 : index
    %c1 = arith.constant 1 : index
    %200 = vector.load %arg8[%c0_95, %c1] : memref<16x640xf32, #tpu.memory_space<vmem>>, vector<16x512xf32>
    %201 = arith.truncf %200 : vector<16x512xf32> to vector<16x512xbf16>
    %c0_96 = arith.constant 0 : index
    %c2 = arith.constant 2 : index
    %202 = vector.load %arg8[%c0_96, %c2] : memref<16x640xf32, #tpu.memory_space<vmem>>, vector<16x512xf32>
    %203 = arith.truncf %202 : vector<16x512xf32> to vector<16x512xbf16>
    %c0_97 = arith.constant 0 : index
    %c20 = arith.constant 20 : index
    %204 = vector.load %arg8[%c0_97, %c20] : memref<16x640xf32, #tpu.memory_space<vmem>>, vector<16x512xf32>
    %205 = arith.truncf %204 : vector<16x512xf32> to vector<16x512xbf16>
    %c0_98 = arith.constant 0 : index
    %c21_99 = arith.constant 21 : index
    %206 = vector.load %arg8[%c0_98, %c21_99] : memref<16x640xf32, #tpu.memory_space<vmem>>, vector<16x512xf32>
    %207 = arith.truncf %206 : vector<16x512xf32> to vector<16x512xbf16>
    %c0_100 = arith.constant 0 : index
    %c22_101 = arith.constant 22 : index
    %208 = vector.load %arg8[%c0_100, %c22_101] : memref<16x640xf32, #tpu.memory_space<vmem>>, vector<16x512xf32>
    %209 = arith.truncf %208 : vector<16x512xf32> to vector<16x512xbf16>
    %c0_102 = arith.constant 0 : index
    %c40 = arith.constant 40 : index
    %210 = vector.load %arg8[%c0_102, %c40] : memref<16x640xf32, #tpu.memory_space<vmem>>, vector<16x512xf32>
    %211 = arith.truncf %210 : vector<16x512xf32> to vector<16x512xbf16>
    %c0_103 = arith.constant 0 : index
    %c41 = arith.constant 41 : index
    %212 = vector.load %arg8[%c0_103, %c41] : memref<16x640xf32, #tpu.memory_space<vmem>>, vector<16x512xf32>
    %213 = arith.truncf %212 : vector<16x512xf32> to vector<16x512xbf16>
    %c0_104 = arith.constant 0 : index
    %c42_105 = arith.constant 42 : index
    %214 = vector.load %arg8[%c0_104, %c42_105] : memref<16x640xf32, #tpu.memory_space<vmem>>, vector<16x512xf32>
    %215 = arith.truncf %214 : vector<16x512xf32> to vector<16x512xbf16>
    %216 = tpu.concatenate %199, %201, %203, %205, %207, %209, %211, %213, %215 in 0 : vector<16x512xbf16>, vector<16x512xbf16>, vector<16x512xbf16>, vector<16x512xbf16>, vector<16x512xbf16>, vector<16x512xbf16>, vector<16x512xbf16>, vector<16x512xbf16>, vector<16x512xbf16> -> vector<144x512xbf16>
    %c0_106 = arith.constant 0 : index
    %c80 = arith.constant 80 : index
    %217 = vector.load %arg4[%c0_106, %c80] : memref<16x368xf32, #tpu.memory_space<vmem>>, vector<16x144xf32>
    %218 = arith.truncf %217 : vector<16x144xf32> to vector<16x144xbf16>
    %cst_107 = arith.constant dense<0.000000e+00> : vector<16x512xf32>
    %219 = tpu.matmul %218, %216, %cst_107 {dimension_numbers = #tpu.dot_dimension_numbers<[1], [0], [0], [1], [0, 0, 1, 1], [], []>} : vector<16x144xbf16>, vector<144x512xbf16>, vector<16x512xf32> -> vector<16x512xf32>
    %c0_108 = arith.constant 0 : index
    %c24 = arith.constant 24 : index
    %220 = vector.load %arg3[%c0_108, %c24] : memref<16x26xf32, #tpu.memory_space<vmem>>, vector<16x1xf32>
    %221 = vector.broadcast %220 : vector<16x1xf32> to vector<16x512xf32>
    %222 = arith.addf %219, %221 : vector<16x512xf32>
    %cst_109 = arith.constant 0.000000e+00 : f32
    %223 = vector.broadcast %cst_109 : f32 to vector<16x512xf32>
    %224 = arith.maximumf %222, %223 : vector<16x512xf32>
    %c0_110 = arith.constant 0 : index
    %c0_111 = arith.constant 0 : index
    %225 = vector.load %arg5[%c0_110, %c0_111] : memref<1x512xf32, #tpu.memory_space<vmem>>, vector<1x512xf32>
    %226 = vector.broadcast %225 : vector<1x512xf32> to vector<16x512xf32>
    %227 = arith.mulf %224, %226 : vector<16x512xf32>
    %228 = arith.truncf %227 : vector<16x512xf32> to vector<16x512xbf16>
    %229 = vector.extract_strided_slice %228 {offsets = [0, 0], sizes = [16, 384], strides = [1, 1]} : vector<16x512xbf16> to vector<16x384xbf16>
    %230 = vector.extract_strided_slice %228 {offsets = [0, 1], sizes = [16, 384], strides = [1, 1]} : vector<16x512xbf16> to vector<16x384xbf16>
    %231 = vector.extract_strided_slice %228 {offsets = [0, 2], sizes = [16, 384], strides = [1, 1]} : vector<16x512xbf16> to vector<16x384xbf16>
    %232 = vector.extract_strided_slice %228 {offsets = [0, 20], sizes = [16, 384], strides = [1, 1]} : vector<16x512xbf16> to vector<16x384xbf16>
    %233 = vector.extract_strided_slice %228 {offsets = [0, 21], sizes = [16, 384], strides = [1, 1]} : vector<16x512xbf16> to vector<16x384xbf16>
    %234 = vector.extract_strided_slice %228 {offsets = [0, 22], sizes = [16, 384], strides = [1, 1]} : vector<16x512xbf16> to vector<16x384xbf16>
    %235 = vector.extract_strided_slice %228 {offsets = [0, 40], sizes = [16, 384], strides = [1, 1]} : vector<16x512xbf16> to vector<16x384xbf16>
    %236 = vector.extract_strided_slice %228 {offsets = [0, 41], sizes = [16, 384], strides = [1, 1]} : vector<16x512xbf16> to vector<16x384xbf16>
    %237 = vector.extract_strided_slice %228 {offsets = [0, 42], sizes = [16, 384], strides = [1, 1]} : vector<16x512xbf16> to vector<16x384xbf16>
    %238 = tpu.concatenate %229, %230, %231, %232, %233, %234, %235, %236, %237 in 0 : vector<16x384xbf16>, vector<16x384xbf16>, vector<16x384xbf16>, vector<16x384xbf16>, vector<16x384xbf16>, vector<16x384xbf16>, vector<16x384xbf16>, vector<16x384xbf16>, vector<16x384xbf16> -> vector<144x384xbf16>
    %c0_112 = arith.constant 0 : index
    %c224 = arith.constant 224 : index
    %239 = vector.load %arg4[%c0_112, %c224] : memref<16x368xf32, #tpu.memory_space<vmem>>, vector<8x144xf32>
    %240 = arith.truncf %239 : vector<8x144xf32> to vector<8x144xbf16>
    %cst_113 = arith.constant dense<0.000000e+00> : vector<8x384xf32>
    %241 = tpu.matmul %240, %238, %cst_113 {dimension_numbers = #tpu.dot_dimension_numbers<[1], [0], [0], [1], [0, 0, 1, 1], [], []>} : vector<8x144xbf16>, vector<144x384xbf16>, vector<8x384xf32> -> vector<8x384xf32>
    %c0_114 = arith.constant 0 : index
    %c25 = arith.constant 25 : index
    %242 = vector.load %arg3[%c0_114, %c25] : memref<16x26xf32, #tpu.memory_space<vmem>>, vector<8x1xf32>
    %243 = vector.broadcast %242 : vector<8x1xf32> to vector<8x384xf32>
    %244 = arith.addf %241, %243 : vector<8x384xf32>
    %245 = arith.negf %244 : vector<8x384xf32>
    %246 = math.exp %245 : vector<8x384xf32>
    %cst_115 = arith.constant 1.000000e+00 : f32
    %247 = vector.broadcast %cst_115 : f32 to vector<8x384xf32>
    %248 = arith.addf %247, %246 : vector<8x384xf32>
    %249 = arith.divf %247, %248 : vector<8x384xf32>
    %c0_116 = arith.constant 0 : index
    %c0_117 = arith.constant 0 : index
    %c0_118 = arith.constant 0 : index
    %250 = vector.load %arg7[%c0_116, %c0_117, %c0_118] : memref<1x8x384xf32, #tpu.memory_space<vmem>>, vector<1x8x384xf32>
    %251 = vector.shape_cast %250 : vector<1x8x384xf32> to vector<8x384xf32>
    %252 = vector.shape_cast %249 : vector<8x384xf32> to vector<1x8x384xf32>
    tpu.vector_store %arg7[%c0_116, %c0_117, %c0_118], %252 {strides = array<i32>} : memref<1x8x384xf32, #tpu.memory_space<vmem>>, vector<1x8x384xf32>,
    return
  }
  func.func @transform_0(%arg0: i32) -> (i32, i32, i32) {
    %c0_i32 = arith.constant 0 : i32
    %c0_i32_0 = arith.constant 0 : i32
    %c0_i32_1 = arith.constant 0 : i32
    return %arg0, %c0_i32, %c0_i32_0 : i32, i32, i32
  }
  func.func @transform_1(%arg0: i32) -> (i32, i32, i32) {
    %c0_i32 = arith.constant 0 : i32
    %c0_i32_0 = arith.constant 0 : i32
    %c0_i32_1 = arith.constant 0 : i32
    return %arg0, %c0_i32, %c0_i32_0 : i32, i32, i32
  }
  func.func @transform_2(%arg0: i32) -> (i32, i32) {
    %c0_i32 = arith.constant 0 : i32
    %c0_i32_0 = arith.constant 0 : i32
    %c0_i32_1 = arith.constant 0 : i32
    return %c0_i32, %c0_i32_0 : i32, i32
  }
  func.func @transform_3(%arg0: i32) -> (i32, i32) {
    %c0_i32 = arith.constant 0 : i32
    %c0_i32_0 = arith.constant 0 : i32
    %c0_i32_1 = arith.constant 0 : i32
    return %c0_i32, %c0_i32_0 : i32, i32
  }
  func.func @transform_4(%arg0: i32) -> (i32, i32) {
    %c0_i32 = arith.constant 0 : i32
    %c0_i32_0 = arith.constant 0 : i32
    %c0_i32_1 = arith.constant 0 : i32
    return %c0_i32, %c0_i32_0 : i32, i32
  }
  func.func @transform_5(%arg0: i32) -> (i32, i32) {
    %c0_i32 = arith.constant 0 : i32
    %c0_i32_0 = arith.constant 0 : i32
    %c0_i32_1 = arith.constant 0 : i32
    return %c0_i32, %c0_i32_0 : i32, i32
  }
  func.func @transform_6(%arg0: i32) -> (i32, i32, i32) {
    %c0_i32 = arith.constant 0 : i32
    %c0_i32_0 = arith.constant 0 : i32
    %c0_i32_1 = arith.constant 0 : i32
    return %arg0, %c0_i32, %c0_i32_0 : i32, i32, i32
  }
}

</mosaic_0001>

<bundles_post_ra>
// kernel: _lambda_.1
= control target key start
LH: loop header
LB: loop body
LE: loop exit
PB: predicated region body
PF: predicated region fallthrough
CT: control target
= control target key end

     0   :  { %s2804_s21 = smov 0   ;;  %s3892_s0 = inlined_call_operand.vmem [shape: f32[2,8,1152], index: 0, kind: input, shape index: {}]   ;;  %s3893_s1 = inlined_call_operand.vmem [shape: f32[2,16,384], index: 1, kind: input, shape index: {}]   ;;  %s3894_s2 = inlined_call_operand.vmem [shape: f32[16,26], index: 2, kind: input, shape index: {}]   ;;  %s3895_s3 = inlined_call_operand.vmem [shape: f32[16,368], index: 3, kind: input, shape index: {}]   ;;  %s3896_s4 = inlined_call_operand.vmem [shape: f32[1,512], index: 4, kind: input, shape index: {}]   ;;  %s3897_s5 = inlined_call_operand.vmem [shape: bf16[128,640], index: 5, kind: input, shape index: {}]   ;;  %s3898_s6 = inlined_call_operand.vmem [shape: f32[2,8,384], index: 6, kind: output, shape index: {}]  }
   0x1 LB: > { %s2327_s22 = sadd.s32 4294967295, %s2704_s21   ;;  %p2331_p0 = scmp.ge.s32.totalorder %s2704_s21, 1  ;;  %s2704_s21 = sphi %s2804_s21, %s16_s21  }
   0x2   : > { %p222_p1 = scmp.lt.s32.totalorder %s2704_s21, 3 }
   0x4   : > { %p223_p2 = pnand %p2331_p0, %p222_p1 }
   0x5   : > { %p257_p3 = scmp.lt.s32.totalorder (!%p223_p2), %s2327_s22, 1  ;;  %s2713_s29 = smov (!%p223_p2), 120  }
   0x6   : > { %226 = sbr.rel (%p223_p2) target bundleno = 2054 (0x806), region = 44  ;;  %s2716_s30 = smov (!%p223_p2), 16  }
   0x7   : > { %s2718_s7 = smov (!%p223_p2), 8   ;;  %s2720_s8 = smov (!%p223_p2), 112  }
   0x8   : > { %s2724_s15 = smov (!%p223_p2), 124   ;;  %s2727_s16 = smov (!%p223_p2), 72  }
   0x9   : > { %s2730_s17 = smov (!%p223_p2), 68   ;;  %s2734_s24 = smov (!%p223_p2), 60  }
   0xa   : > { %s2737_s26 = smov (!%p223_p2), 64   ;;  %s2739_s27 = smov (!%p223_p2), 48  }
   0xb   : > { %v2815_v0 = vld [vmem:[%s3894_s2] sm:$0xff]  ;;  %v2706_v1 = vmov 7   ;;  %v2707_v2 = vmov 5   ;;  %v2708_v3 = vmov 3   ;;  %v2709_v4 = vmov 6   ;;  %s3900_s22 = smov (!%p257_p3, %s2327_s22), 1 }
   0xc   : > { %2630 = vset.pattern.permute.xlu0 %v2706_v1  ;;  %2632 = vset.pattern.permute.xlu1 %v2707_v2  ;;  %v2710_v5 = vmov 2   ;;  %v2711_v6 = vmov 4   ;;  %v2712_v7 = vmov 1   ;;  %s2557_s25 = smul.u32 72, %s3900_s22  ;;  %v2714_v18 = vmov 8   ;;  %v2929_v53 = vld [vmem:[%s3894_s2 + $0x8] sm:$0xff] }
   0xd   : > { %373 = vperm.xlu0 %2630, %v2815_v0   ;;  %347 = vperm.xlu1 %2632, %v2815_v0   ;;  %v2715_v21 = vmov 0   ;;  %vm405_vm0 = vcmask 982016   ;;  %v2717_v32 = vmov 9   ;;  %v2719_v38 = vmov 19   ;;  %s2558_s11 = smul.u32 48, %s3900_s22  ;;  %s2744_s12 = smov 122  }
   0xe   : > { %2634 = vset.pattern.permute.xlu2 %v2712_v7  ;;  %s2828_s28 = scalar_lea.vmem %s3892_s0, %s2557_s25  ;;  %vm430_vm1 = vcmask 130048   ;;  %v2721_v56 = vmov 15   ;;  %v2722_v61 = vmov 17   ;;  %vm540_vm2 = vcmask 64512   ;;  %s2735_s25 = smov 96  }
   0xf   : > { %v2831_v8 = vld [vmem:[%s2828_s28 + $0x30] sm:$0xff]  ;;  %v2834_v9 = vld [vmem:[%s2828_s28 + $0x20] sm:$0xff]  ;;  %v2837_v10 = vld [vmem:[%s2828_s28 + $0x18] sm:$0xff]  ;;  %s2968_s14 = scalar_lea.vmem %s3893_s1, %s2558_s11  ;;  %vm515_vm3 = vcmask 916480   ;;  %vm1019_vm4 = vcmask 1014784   ;;  %vm1038_vm5 = vcmask 588800  }
  0x10   : > { %v2853_v16 = vld [vmem:[%s2828_s28 + $0x28] sm:$0xff]  ;;  %v2868_v22 = vld [vmem:[%s2828_s28 + $0x10] sm:$0xff]  ;;  %v2889_v34 = vld [vmem:[%s2828_s28] sm:$0xff]  ;;  %vm1131_vm6 = vcmask 490496   ;;  %vm1200_vm7 = vcmask 261120   ;;  %vm805_vm8 = vcmask 474448  }
  0x11   : > { %v2886_v33 = vld [vmem:[%s2828_s28 + $0x8] sm:$0xff]  ;;  %v2640_v52 = vpack.i.bf16 %v2837_v10, %v2868_v22  ;;  %v2935_v54 = vld [vmem:[%s2828_s28 + $0x38] sm:$0xff]  ;;  %s2743_s11 = smov 110   ;;  %s2745_s13 = smov 86   ;;  %vm828_vm9 = vcmask 80896   ;;  %vm833_vm10 = vcmask 244848  }
  0x12   : > { %vm838_vm11 = vcmask 408848   ;;  %vm810_vm12 = vcmask 638448   ;;  %vm843_vm13 = vcmask 572848   ;;  %vm815_vm14 = vcmask 802448   ;;  %s2750_s9 = smov 62   ;;  %s2751_s10 = smov 74  }
  0x13   : > { %vm820_vm15 = vcmask 966448   ;;  %s2758_s18 = smov 87   ;;  %s2759_s19 = smov 126  }
  0x14   : > { %s2760_s20 = smov 88   ;;  %s2761_s23 = smov 127  }
  0x15   : > { %2631 = vset.pattern.permute.xlu0 %v2708_v3  ;;  %2633 = vset.pattern.permute.xlu1 %v2709_v4 }
  0x16   : > { %325 = vperm.xlu0 %2631, %v2815_v0   ;;  %360 = vperm.xlu1 %2633, %v2815_v0  }
  0x1e   : > { %2635 = vset.pattern.permute.xlu0 %v2710_v5  ;;  %2636 = vset.pattern.permute.xlu1 %v2711_v6  ;;  %v2723_v6 = vmov 18  }
  0x1f   : > { %312 = vperm.xlu0 %2635, %v2815_v0  }
  0x27   : > { %2649 = vset.pattern.permute.xlu0 %v2722_v61 }
  0x7f   : > { %v2839_v11 = vpop.permute.xlu0 %373  ;;  %v2841_v12 = vpop.permute.xlu1 %347 }
  0x80   : > { %v378_v13 = vmul.f32 %v2839_v11, %v2831_v8  ;;  %v376_v14 = vmul.f32 %v2839_v11, %v2834_v9  ;;  %v351_v15 = vmul.f32 %v2841_v12, %v2837_v10  ;;  %v377_v17 = vmul.f32 %v2839_v11, %v2853_v16 }
  0x81   : > { %v352_v23 = vmul.f32 %v2834_v9, %v2841_v12  ;;  %v350_v25 = vmul.f32 %v2841_v12, %v2868_v22  ;;  %v379_v55 = vmul.f32 %v2839_v11, %v2935_v54 }
  0x82   : > { %482 = vrot.lane.b32.xlu1 %v378_v13, %s2713_s29  ;;  %478 = vrot.lane.b32.xlu2 %v376_v14, %s2713_s29 }
  0x83   : > { %451 = vrot.lane.b32.xlu0 %v351_v15, %s2713_s29 }
  0x88   : > { %v2861_v19 = vpop.permute.xlu0 %325  ;;  %v2879_v27 = vpop.permute.xlu1 %360 }
  0x89   : > { %v329_v20 = vmul.f32 %v2837_v10, %v2861_v19  ;;  %v328_v24 = vmul.f32 %v2861_v19, %v2868_v22  ;;  %v363_v28 = vmul.f32 %v2834_v9, %v2879_v27  ;;  %v364_v40 = vmul.f32 %v2853_v16, %v2879_v27 }
  0x8a   : > { %338 = vperm.xlu1 %2636, %v2815_v0   ;;  %480 = vrot.lane.b32.xlu2 %v377_v17, %s2713_s29 }
  0x91   : > { %v2907_v44 = vpop.permute.xlu0 %312 }
  0x92   : > { %2637 = vset.pattern.permute.xlu1 %v2714_v18  ;;  %303 = vperm.xlu2 %2634, %v2815_v0   ;;  %v315_v45 = vmul.f32 %v2907_v44, %v2889_v34  ;;  %v316_v58 = vmul.f32 %v2907_v44, %v2886_v33 }
  0x93   : > { %382 = vperm.xlu1 %2637, %v2815_v0  }
  0x9a   : > { %2638 = vset.pattern.permute.xlu2 %v2715_v21 }
  0x9b   : > { %290 = vperm.xlu2 %2638, %v2815_v0   ;;  %424 = vrot.lane.b32.xlu1 %v329_v20, %s2716_s30  ;;  %v2975_v20 = vld [vmem:[%s2968_s14 + $0x20] sm:$0xff] }
  0x9c   : > { %2645 = vset.pattern.permute.xlu1 %v2719_v38 }
  0xa3   : > { %453 = vrot.lane.b32.xlu1 %v352_v23, %s2713_s29  ;;  %422 = vrot.lane.b32.xlu2 %v328_v24, %s2716_s30 }
  0xa4   : > { %2639 = vset.pattern.permute.xlu2 %v2717_v32 }
  0xab   : > { %449 = vrot.lane.b32.xlu2 %v350_v25, %s2713_s29 }
  0xdc   : > { %v479_v26 = vpop.permute.xlu2 %478 }
  0xe4   : > { %v481_v29 = vpop.permute.xlu2 %480 }
  0xe5   : > { %v488_v30 = vsel %vm405_vm0, %v479_v26, %v481_v29 }
  0xe6   : > { %v496_v31 = vadd.f32 %v488_v30, %v363_v28  ;;  %v353_v30 = vmul.f32 %v2853_v16, %v2841_v12 }
  0xe8   : > { %532 = vrot.lane.b32.xlu2 %v496_v31, %s2718_s7  ;;  %v2725_v31 = vmov 13  }
  0xec   : > { %v2891_v35 = vpop.permute.xlu2 %303 }
  0xed   : > { %v307_v36 = vmul.f32 %v2891_v35, %v2886_v33  ;;  %v306_v37 = vmul.f32 %v2891_v35, %v2889_v34 }
  0xef   : > { %397 = vrot.lane.b32.xlu1 %v307_v36, %s2713_s29  ;;  %395 = vrot.lane.b32.xlu0 %v306_v37, %s2713_s29  ;;  %v2726_v37 = vmov 14  }
  0xf4   : > { %v2899_v39 = vpop.permute.xlu1 %482 }
  0xf5   : > { %v489_v41 = vsel %vm405_vm0, %v481_v29, %v2899_v39  ;;  %v2905_v42 = vpop.permute.xlu2 %290  ;;  %v452_v63 = vpop.permute.xlu0 %451 }
  0xf6   : > { %v497_v43 = vadd.f32 %v489_v41, %v364_v40  ;;  %v2999_v40 = vld [vmem:[%s2968_s14 + $0x10] sm:$0xff] }
  0xf8   : > { %534 = vrot.lane.b32.xlu0 %v497_v43, %s2718_s7 }
  0xfc   : > { %v2912_v46 = vpop.permute.xlu1 %338 }
  0xfd   : > { %v423_v47 = vpop.permute.xlu2 %422  ;;  %v341_v2 = vmul.f32 %v2912_v46, %v2868_v22  ;;  %v342_v18 = vmul.f32 %v2912_v46, %v2837_v10 }
  0xfe   : > { %v439_v48 = vadd.f32 %v423_v47, %v315_v45 }
 0x100   : > { %505 = vrot.lane.b32.xlu2 %v439_v48, %s2720_s8  ;;  %v3008_v48 = vld [vmem:[%s2968_s14 + $0x28] sm:$0xff] }
 0x105   : > { %v2915_v49 = vpop.permute.xlu1 %382  ;;  %v450_v62 = vpop.permute.xlu2 %449 }
 0x106   : > { %v386_v50 = vmul.f32 %v2915_v49, %v2853_v16  ;;  %v385_v51 = vmul.f32 %v2915_v49, %v2834_v9  ;;  %v459_v1 = vsel %vm405_vm0, %v450_v62, %v452_v63 }
 0x107   : > { %v468_v3 = vadd.f32 %v459_v1, %v341_v2  ;;  %v3034_v1 = vld [vmem:[%s2968_s14 + $0x18] sm:$0xff] }
 0x108   : > { %588 = vrot.lane.b32.xlu1 %v386_v50, %s2720_s8  ;;  %609 = vperm.xlu2 %2639, %v2815_v0  }
 0x109   : > { %586 = vrot.lane.b32.xlu0 %v385_v51, %s2720_s8  ;;  %v3013_v51 = vld [vmem:[%s2968_s14] sm:$0xff] }
 0x10d   : > { %v2939_v57 = vpop.permute.xlu1 %424 }
 0x10e   : > { %v431_v59 = vsel %vm430_vm1, %v423_v47, %v2939_v57 }
 0x10f   : > { %v440_v60 = vadd.f32 %v431_v59, %v316_v58 }
 0x110   : > { %984 = vperm.xlu1 %2645, %v2815_v0   ;;  %2646 = vset.pattern.permute.xlu2 %v2719_v38  ;;  %v2996_v38 = vld [vmem:[%s2968_s14 + $0x8] sm:$0xff]  ;;  %s2746_s14 = smov 98  }
 0x111   : > { %2641 = vrot.lane.b32.xlu0 %v2640_v52, %s2713_s29  ;;  %988 = vperm.xlu2 %2646, %v2929_v53   ;;  %v330_v52 = vmul.f32 %v2834_v9, %v2861_v19 }
 0x115   : > { %v2963_v15 = vpop.permute.xlu1 %453 }
 0x116   : > { %v460_v17 = vsel %vm405_vm0, %v452_v63, %v2963_v15  ;;  %v2728_v63 = vmov 16  }
 0x117   : > { %v469_v21 = vadd.f32 %v460_v17, %v342_v18  ;;  %v2729_v17 = vmov 20  }
 0x118   : > { %2647 = vset.pattern.permute.xlu1 %v2721_v56 }
 0x119   : > { %484 = vrot.lane.b32.xlu0 %v379_v55, %s2713_s29  ;;  %934 = vperm.xlu1 %2647, %v2815_v0  }
 0x11a   : > { %2648 = vset.pattern.permute.xlu2 %v2721_v56 }
 0x11b   : > { %938 = vperm.xlu2 %2648, %v2929_v53  }
 0x121   : > { %507 = vrot.lane.b32.xlu0 %v440_v60, %s2720_s8  ;;  %2650 = vset.pattern.permute.xlu1 %v2722_v61  ;;  %v365_v60 = vmul.f32 %v2831_v8, %v2879_v27 }
 0x123   : > { %2651 = vset.pattern.permute.xlu2 %v2723_v6 }
 0x129   : > { %958 = vperm.xlu0 %2649, %v2815_v0  }
 0x131   : > { %2653 = vset.pattern.permute.xlu0 %v2725_v31 }
 0x142   : > { %v533_v4 = vpop.permute.xlu2 %532 }
 0x143   : > { %v549_v5 = vadd.f32 %v533_v4, %v468_v3 }
 0x145   : > { %559 = vrot.lane.b32.xlu1 %v549_v5, %s2713_s29 }
 0x14d   : > { %962 = vperm.xlu1 %2650, %v2929_v53  }
 0x155   : > { %2652 = vset.pattern.permute.xlu1 %v2723_v6 }
 0x156   : > { %974 = vperm.xlu1 %2652, %v2929_v53  }
 0x15a   : > { %v2956_v7 = vpop.permute.xlu2 %505 }
 0x15e   : > { %2654 = vset.pattern.permute.xlu1 %v2725_v31 }
 0x161   : > { %v2958_v13 = vpop.permute.xlu0 %395  ;;  %v2984_v29 = vpop.permute.xlu1 %397 }
 0x162   : > { %v2960_v14 = vpop.permute.xlu2 %609 }
 0x16a   : > { %v2977_v23 = vpop.permute.xlu0 %534 }
 0x16b   : > { %v541_v24 = vsel %vm540_vm2, %v533_v4, %v2977_v23  ;;  %v989_v25 = vpop.permute.xlu2 %988 }
 0x16c   : > { %v993_v26 = vmul.f32 %v989_v25, %v2975_v20  ;;  %v550_v28 = vadd.f32 %v541_v24, %v469_v21  ;;  %v994_v50 = vmul.f32 %v989_v25, %v3008_v48 }
 0x16e   : > { %1079 = vrot.lane.b32.xlu1 %v993_v26, %s2724_s15  ;;  %561 = vrot.lane.b32.xlu2 %v550_v28, %s2713_s29  ;;  %v406_v28 = vsel %vm405_vm0, %v2958_v13, %v2984_v29 }
 0x176   : > { %455 = vrot.lane.b32.xlu1 %v353_v30, %s2713_s29  ;;  %970 = vperm.xlu2 %2651, %v2815_v0   ;;  %v293_v30 = vmul.f32 %v2889_v34, %v2905_v42 }
 0x17a   : > { %v2990_v32 = vpop.permute.xlu1 %588 }
 0x17b   : > { %v2992_v36 = vpop.permute.xlu0 %586 }
 0x17c   : > { %v596_v13 = vsel %vm515_vm3, %v2992_v36, %v2990_v32 }
 0x17e   : > { %914 = vperm.xlu1 %2654, %v2929_v53   ;;  %2655 = vset.pattern.permute.xlu2 %v2726_v37 }
 0x182   : > { %v985_v41 = vpop.permute.xlu1 %984 }
 0x183   : > { %v991_v43 = vmul.f32 %v985_v41, %v2996_v38  ;;  %v992_v45 = vmul.f32 %v985_v41, %v2999_v40  ;;  %v3003_v47 = vpop.permute.xlu0 %2641 }
 0x184   : > { %v2644_v34 = vunpack.i.h.bf16 %v3003_v47 }
 0x185   : > { %1077 = vrot.lane.b32.xlu0 %v992_v45, %s2724_s15  ;;  %1075 = vrot.lane.b32.xlu2 %v991_v43, %s2724_s15 }
 0x186   : > { %2656 = vset.pattern.permute.xlu1 %v2726_v37  ;;  %v414_v37 = vadd.f32 %v406_v28, %v293_v30  ;;  %v308_v28 = vmul.f32 %v2868_v22, %v2891_v35 }
 0x187   : > { %926 = vperm.xlu1 %2656, %v2929_v53  }
 0x18b   : > { %v935_v55 = vpop.permute.xlu1 %934  ;;  %v3018_v58 = vpop.permute.xlu0 %484 }
 0x18c   : > { %v941_v56 = vmul.f32 %v935_v55, %v3013_v51  ;;  %v490_v59 = vsel %vm405_vm0, %v2899_v39, %v3018_v58  ;;  %v939_v39 = vpop.permute.xlu2 %938  ;;  %v942_v6 = vmul.f32 %v2996_v38, %v935_v55 }
 0x18d   : > { %426 = vrot.lane.b32.xlu0 %v330_v52, %s2716_s30  ;;  %1081 = vrot.lane.b32.xlu2 %v994_v50, %s2724_s15  ;;  %v498_v61 = vadd.f32 %v490_v59, %v365_v60  ;;  %v943_v3 = vmul.f32 %v939_v39, %v3034_v1  ;;  %v944_v18 = vmul.f32 %v2975_v20, %v939_v39  ;;  %v2643_v52 = vunpack.i.l.bf16 %v3003_v47 }
 0x18e   : > { %v387_v59 = vmul.f32 %v2915_v49, %v2831_v8 }
 0x18f   : > { %1030 = vrot.lane.b32.xlu1 %v941_v56, %s2727_s16  ;;  %v635_v56 = vsel %vm405_vm0, %v2643_v52, %v2644_v34 }
 0x190   : > { %2660 = vset.pattern.permute.xlu1 %v2729_v17 }
 0x193   : > { %v3029_v62 = vpop.permute.xlu0 %507 }
 0x194   : > { %v516_v31 = vsel %vm515_vm3, %v2956_v7, %v3029_v62 }
 0x195   : > { %536 = vrot.lane.b32.xlu2 %v498_v61, %s2718_s7  ;;  %910 = vperm.xlu0 %2653, %v2815_v0   ;;  %v524_v41 = vadd.f32 %v516_v31, %v414_v37 }
 0x197   : > { %1034 = vrot.lane.b32.xlu1 %v943_v3, %s2727_s16 }
 0x19b   : > { %v959_v2 = vpop.permute.xlu0 %958 }
 0x19c   : > { %v965_v4 = vmul.f32 %v959_v2, %v3013_v51  ;;  %v966_v5 = vmul.f32 %v2996_v38, %v959_v2 }
 0x19d   : > { %2658 = vset.pattern.permute.xlu0 %v2728_v63  ;;  %922 = vperm.xlu2 %2655, %v2815_v0  }
 0x19e   : > { %950 = vperm.xlu0 %2658, %v2929_v53  }
 0x19f   : > { %1055 = vrot.lane.b32.xlu1 %v966_v5, %s2724_s15 }
 0x1a5   : > { %2657 = vset.pattern.permute.xlu2 %v2728_v63 }
 0x1a6   : > { %946 = vperm.xlu2 %2657, %v2815_v0   ;;  %1053 = vrot.lane.b32.xlu0 %v965_v4, %s2724_s15 }
 0x1a7   : > { %2659 = vset.pattern.permute.xlu0 %v2729_v17  ;;  %v647_v17 = vld [vmem:[%s3895_s3] sm:$0xff] }
 0x1ae   : > { %1032 = vrot.lane.b32.xlu2 %v942_v6, %s2727_s16 }
 0x1b6   : > { %1036 = vrot.lane.b32.xlu2 %v944_v18, %s2727_s16  ;;  %v648_v18 = vld [vmem:[%s3895_s3 + $0x18] sm:$0xff]  ;;  %s2748_s16 = smov 6  }
 0x1b7   : > { %v560_v21 = vpop.permute.xlu1 %559 }
 0x1bf   : > { %v963_v24 = vpop.permute.xlu1 %962 }
 0x1c0   : > { %v967_v25 = vmul.f32 %v963_v24, %v3034_v1  ;;  %v968_v26 = vmul.f32 %v2975_v20, %v963_v24  ;;  %v2731_v24 = vmov 10  }
 0x1c1   : > { %2662 = vset.pattern.permute.xlu2 %v2731_v24 }
 0x1c2   : > { %1059 = vrot.lane.b32.xlu0 %v968_v26, %s2724_s15  ;;  %1057 = vrot.lane.b32.xlu2 %v967_v25, %s2724_s15 }
 0x1c8   : > { %v3056_v43 = vpop.permute.xlu2 %561  ;;  %v975_v63 = vpop.permute.xlu1 %974 }
 0x1c9   : > { %v569_v45 = vsel %vm405_vm0, %v560_v21, %v3056_v43  ;;  %v978_v39 = vmul.f32 %v2975_v20, %v975_v63  ;;  %v3083_v21 = vpack.c.bf16 %v648_v18, %v647_v17 }
 0x1ca   : > { %v577_v50 = vadd.f32 %v569_v45, %v524_v41  ;;  %996 = vperm.xlu0 %2659, %v2815_v0  }
 0x1cc   : > { %v604_v55 = vadd.f32 %v596_v13, %v577_v50 }
 0x1ce   : > { %v612_v7 = vadd.f32 %v2960_v14, %v604_v55 }
 0x1d0   : > { %v616_v60 = vmax.f32 %v612_v7, 0.0  ;;  %v971_v36 = vpop.permute.xlu2 %970  ;;  %v2732_v7 = vmov 12  }
 0x1d1   : > { %v977_v30 = vmul.f32 %v2996_v38, %v971_v36 }
 0x1d2   : > { %590 = vrot.lane.b32.xlu0 %v387_v59, %s2720_s8  ;;  %v643_v61 = vpack.c.bf16 %v635_v56, %v616_v60  ;;  %v317_v59 = vmul.f32 %v2868_v22, %v2907_v44 }
 0x1d4   : > { %672 = vmatpush.bf16.msra.mxu0 %v643_v61 }
 0x1d7   : > { %2335 = vmatmul.msk.bf16.vlgmr.msra.gmra.mxu0 %vm430_vm1, %v3083_v21 }
 0x1da   : > { %629 = vrot.lane.b32.xlu0 %v2834_v9, %s2713_s29 }
 0x1df   : > { %v1076_v2 = vpop.permute.xlu2 %1075 }
 0x1e0   : > { %v1080_v3 = vpop.permute.xlu1 %1079 }
 0x1e7   : > { %v1082_v4 = vpop.permute.xlu2 %1081 }
 0x1e8   : > { %v1084_v5 = vsel %vm1019_vm4, %v1080_v3, %v1082_v4  ;;  %v3087_v25 = vpop.permute.xlu1 %455 }
 0x1e9   : > { %v1088_v6 = vadd.f32 %v1084_v5, %v978_v39  ;;  %v3117_v5 = vpack.c.bf16 %v647_v17, %v647_v17 }
 0x1eb   : > { %1111 = vrot.lane.b32.xlu2 %v1088_v6, %s2730_s17 }
 0x1ef   : > { %v3089_v26 = vpop.permute.xlu2 %536 }
 0x1f0   : > { %v915_v45 = vpop.permute.xlu1 %914 }
 0x1f1   : > { %v919_v61 = vmul.f32 %v915_v45, %v3034_v1 }
 0x1f3   : > { %399 = vrot.lane.b32.xlu2 %v308_v28, %s2713_s29 }
 0x1f7   : > { %v1078_v31 = vpop.permute.xlu0 %1077  ;;  %v923_v50 = vpop.permute.xlu2 %922 }
 0x1f8   : > { %v1083_v37 = vsel %vm1019_vm4, %v1076_v2, %v1078_v31  ;;  %v929_v3 = vmul.f32 %v923_v50, %v3013_v51 }
 0x1f9   : > { %v1087_v41 = vadd.f32 %v1083_v37, %v977_v30  ;;  %v927_v52 = vpop.permute.xlu1 %926 }
 0x1fa   : > { %v932_v31 = vmul.f32 %v2975_v20, %v927_v52 }
 0x1fb   : > { %1109 = vrot.lane.b32.xlu1 %v1087_v41, %s2730_s17  ;;  %659 = vperm.xlu2 %2662, %v2929_v53   ;;  %s2749_s17 = smov 18  }
 0x1ff   : > { %v3097_v13 = vpop.permute.xlu0 %426 }
 0x200   : > { %v3100_v55 = vpop.permute.xlu2 %946  ;;  %v432_v56 = vsel %vm430_vm1, %v2939_v57, %v3097_v13  ;;  %v920_v57 = vmul.f32 %v2975_v20, %v915_v45  ;;  %v3130_v45 = vld [vmem:[%s2828_s28 + $0x40] sm:$0xff] }
 0x201   : > { %v441_v63 = vadd.f32 %v432_v56, %v317_v59  ;;  %v1031_v2 = vpop.permute.xlu1 %1030 }
 0x203   : > { %1000 = vperm.xlu1 %2660, %v2929_v53   ;;  %2664 = vset.pattern.permute.xlu2 %v2732_v7 }
 0x204   : > { %900 = vperm.xlu2 %2664, %v2929_v53  }
 0x207   : > { %v911_v60 = vpop.permute.xlu0 %910 }
 0x208   : > { %v917_v36 = vmul.f32 %v911_v60, %v3013_v51  ;;  %v1033_v39 = vpop.permute.xlu2 %1032  ;;  %v918_v41 = vmul.f32 %v2996_v38, %v911_v60 }
 0x209   : > { %v1039_v4 = vsel %vm1038_vm5, %v1031_v2, %v1033_v39  ;;  %v1035_v6 = vpop.permute.xlu1 %1034 }
 0x20a   : > { %1011 = vrot.lane.b32.xlu0 %v917_v36, %s2724_s15  ;;  %v1045_v18 = vadd.f32 %v1039_v4, %v929_v3  ;;  %v2733_v36 = vmov 21  }
 0x20b   : > { %509 = vrot.lane.b32.xlu1 %v441_v63, %s2720_s8  ;;  %2676 = vset.pattern.permute.xlu0 %v2733_v36 }
 0x20c   : > { %2661 = vset.pattern.permute.xlu1 %v2731_v24  ;;  %1015 = vrot.lane.b32.xlu2 %v919_v61, %s2724_s15  ;;  %v931_v24 = vmul.f32 %v927_v52, %v3034_v1  ;;  %v380_v52 = vmul.f32 %v2839_v11, %v3130_v45 }
 0x20d   : > { %2675 = vset.pattern.permute.xlu2 %v2733_v36 }
 0x210   : > { %v1037_v28 = vpop.permute.xlu2 %1036  ;;  %v951_v56 = vpop.permute.xlu0 %950 }
 0x211   : > { %v1040_v30 = vsel %vm1038_vm5, %v1035_v6, %v1037_v28  ;;  %v1048_v17 = vadd.f32 %v1037_v28, %v932_v31  ;;  %v955_v63 = vmul.f32 %v951_v56, %v3034_v1  ;;  %v2665_v6 = vpack.i.bf16 %v2996_v38, %v3013_v51 }
 0x212   : > { %1017 = vrot.lane.b32.xlu0 %v920_v57, %s2724_s15  ;;  %v1047_v37 = vadd.f32 %v1040_v30, %v931_v24  ;;  %v309_v24 = vmul.f32 %v2837_v10, %v2891_v35  ;;  %v953_v28 = vmul.f32 %v3100_v55, %v3013_v51  ;;  %v954_v30 = vmul.f32 %v2996_v38, %v3100_v55 }
 0x213   : > { %654 = vperm.xlu1 %2661, %v2815_v0   ;;  %vm861_vm5 = vcmask 15360  }
 0x214   : > { %740 = vrot.lane.b32.xlu2 %v3117_v5, %s2720_s8 }
 0x218   : > { %v1054_v61 = vpop.permute.xlu0 %1053 }
 0x21a   : > { %1093 = vrot.lane.b32.xlu0 %v1045_v18, %s2713_s29  ;;  %v1056_v18 = vpop.permute.xlu1 %1055 }
 0x21b   : > { %2663 = vset.pattern.permute.xlu1 %v2732_v7  ;;  %v930_v7 = vmul.f32 %v2996_v38, %v923_v50  ;;  %v1061_v31 = vsel %vm1019_vm4, %v1054_v61, %v1056_v18  ;;  %v461_v61 = vsel %vm405_vm0, %v2963_v15, %v3087_v25 }
 0x21c   : > { %895 = vperm.xlu1 %2663, %v2815_v0   ;;  %1097 = vrot.lane.b32.xlu2 %v1047_v37, %s2713_s29  ;;  %v1058_v60 = vpop.permute.xlu2 %1057 }
 0x21d   : > { %v1046_v59 = vadd.f32 %v1033_v39, %v930_v7  ;;  %v956_v7 = vmul.f32 %v2975_v20, %v951_v56  ;;  %v343_v56 = vmul.f32 %v2834_v9, %v2912_v46 }
 0x222   : > { %1099 = vrot.lane.b32.xlu0 %v1048_v17, %s2713_s29  ;;  %v1067_v17 = vadd.f32 %v1061_v31, %v953_v28 }
 0x224   : > { %1013 = vrot.lane.b32.xlu1 %v918_v41, %s2724_s15  ;;  %v1068_v41 = vadd.f32 %v1056_v18, %v954_v30  ;;  %s2747_s15 = smov 30  }
 0x22c   : > { %486 = vrot.lane.b32.xlu1 %v380_v52, %s2713_s29 }
 0x234   : > { %1095 = vrot.lane.b32.xlu1 %v1046_v59, %s2713_s29  ;;  %v1060_v2 = vpop.permute.xlu0 %1059 }
 0x235   : > { %v1062_v57 = vsel %vm1019_vm4, %v1058_v60, %v1060_v2  ;;  %v310_v60 = vmul.f32 %v2834_v9, %v2891_v35  ;;  %v542_v35 = vsel %vm540_vm2, %v2977_v23, %v3089_v26 }
 0x236   : > { %v1069_v3 = vadd.f32 %v1062_v57, %v955_v63  ;;  %v1070_v63 = vadd.f32 %v1060_v2, %v956_v7  ;;  %v470_v57 = vadd.f32 %v461_v61, %v343_v56 }
 0x238   : > { %v551_v18 = vadd.f32 %v542_v35, %v470_v57  ;;  %v354_v35 = vmul.f32 %v2831_v8, %v2841_v12  ;;  %v331_v57 = vmul.f32 %v2853_v16, %v2861_v19 }
 0x23c   : > { %v997_v50 = vpop.permute.xlu0 %996 }
 0x23d   : > { %v1004_v39 = vmul.f32 %v997_v50, %v2999_v40 }
 0x244   : > { %v3156_v37 = vpop.permute.xlu0 %590 }
 0x245   : > { %v1112_v4 = vpop.permute.xlu2 %1111 }
 0x246   : > { %v1117_v11 = vadd.f32 %v1112_v4, %v1069_v3 }
 0x248   : > { %1127 = vrot.lane.b32.xlu0 %v1117_v11, %s2734_s24 }
 0x24c   : > { %v3174_v3 = vpop.permute.xlu0 %629 }
 0x24d   : > { %v3152_v40 = vpop.permute.xlu2 %399 }
 0x250   : > { %1144 = vrot.lane.b32.xlu0 %v1004_v39, %s2713_s29 }
 0x254   : > { %v674_v39 = vpop.f32.mrf.mxu0 }
 0x255   : > { %v3163_v55 = vpop.permute.xlu2 %659 }
 0x258   : > { %2666 = vrot.lane.b32.xlu0 %v2665_v6, %s2734_s24  ;;  %v1118_v6 = vadd.f32 %v1112_v4, %v1070_v63 }
 0x25c   : > { %v676_v23 = vpop.f32.mrf.mxu0 }
 0x25d   : > { %v677_v31 = vadd.f32 %v676_v23, %v3163_v55 }
 0x25e   : > { %v901_v15 = vpop.permute.xlu2 %900 }
 0x25f   : > { %v904_v4 = vmul.f32 %v3034_v1, %v901_v15 }
 0x260   : > { %1161 = vperm.xlu0 %2676, %v2929_v53  }
 0x268   : > { %401 = vrot.lane.b32.xlu0 %v309_v24, %s2713_s29  ;;  %v1003_v24 = vmul.f32 %v997_v50, %v2996_v38 }
 0x26d   : > { %v1110_v52 = vpop.permute.xlu1 %1109 }
 0x26e   : > { %v1115_v59 = vadd.f32 %v1110_v52, %v1067_v17  ;;  %v1116_v36 = vadd.f32 %v1110_v52, %v1068_v41  ;;  %v2670_v17 = vpack.i.bf16 %v2975_v20, %v3034_v1  ;;  %v1016_v41 = vpop.permute.xlu2 %1015 }
 0x270   : > { %1125 = vrot.lane.b32.xlu2 %v1116_v36, %s2734_s24  ;;  %1123 = vrot.lane.b32.xlu1 %v1115_v59, %s2734_s24 }
 0x271   : > { %403 = vrot.lane.b32.xlu0 %v310_v60, %s2713_s29  ;;  %v725_v60 = vmax.f32 %v677_v31, 0.0 }
 0x275   : > { %v1001_v11 = vpop.permute.xlu1 %1000 }
 0x276   : > { %v1005_v2 = vmul.f32 %v1001_v11, %v2975_v20  ;;  %v1006_v7 = vmul.f32 %v1001_v11, %v3008_v48  ;;  %v3197_v1 = vpop.permute.xlu2 %740 }
 0x278   : > { %563 = vrot.lane.b32.xlu2 %v551_v18, %s2713_s29  ;;  %1129 = vrot.lane.b32.xlu1 %v1118_v6, %s2734_s24  ;;  %v366_v6 = vmul.f32 %v2935_v54, %v2879_v27 }
 0x27c   : > { %v1012_v28 = vpop.permute.xlu0 %1011 }
 0x27d   : > { %v3180_v30 = vpop.permute.xlu1 %509 }
 0x27e   : > { %v1098_v12 = vpop.permute.xlu2 %1097  ;;  %v517_v27 = vsel %vm515_vm3, %v3029_v62, %v3180_v30 }
 0x280   : > { %1146 = vrot.lane.b32.xlu1 %v1005_v2, %s2713_s29  ;;  %1142 = vrot.lane.b32.xlu2 %v1003_v24, %s2713_s29  ;;  %v407_v2 = vsel %vm405_vm0, %v2984_v29, %v3152_v40  ;;  %v597_v29 = vsel %vm515_vm3, %v2990_v32, %v3156_v37 }
 0x284   : > { %v1018_v52 = vpop.permute.xlu0 %1017 }
 0x285   : > { %v3188_v38 = vpop.permute.xlu1 %654  ;;  %v1021_v50 = vsel %vm1019_vm4, %v1016_v41, %v1018_v52 }
 0x286   : > { %v3192_v59 = vadd.f32 %v1021_v50, %v904_v4  ;;  %v675_v36 = vadd.f32 %v674_v39, %v3188_v38 }
 0x288   : > { %2671 = vrot.lane.b32.xlu1 %v2670_v17, %s2734_s24  ;;  %1148 = vrot.lane.b32.xlu2 %v1006_v7, %s2713_s29  ;;  %v721_v61 = vmax.f32 %v675_v36, 0.0  ;;  %s2762_s24 = smov 106  }
 0x28a   : > { %v731_v56 = vpack.c.bf16 %v725_v60, %v721_v61  ;;  %v636_v60 = vsel %vm405_vm0, %v2644_v34, %v3174_v3 }
 0x28c   : > { %752 = vmatpush.bf16.msrb.mxu0 %v731_v56  ;;  %v1094_v24 = vpop.permute.xlu0 %1093 }
 0x28e   : > { %v896_v20 = vpop.permute.xlu1 %895 }
 0x28f   : > { %2339 = vmatmul.msk.bf16.vlgmr.msrb.gmra.mxu0 %vm430_vm1, %v3197_v1  ;;  %v903_v48 = vmul.f32 %v3013_v51, %v896_v20 }
 0x290   : > { %1198 = vrot.lane.b32.xlu1 %v3083_v21, %s2735_s25  ;;  %1157 = vperm.xlu2 %2675, %v2815_v0   ;;  %s2763_s25 = smov 107  }
 0x294   : > { %v1100_v23 = vpop.permute.xlu0 %1099 }
 0x295   : > { %v1102_v47 = vsel %vm405_vm0, %v1098_v12, %v1100_v23 }
 0x296   : > { %v1014_v63 = vpop.permute.xlu1 %1013 }
 0x297   : > { %v1020_v11 = vsel %vm1019_vm4, %v1012_v28, %v1014_v63  ;;  %v294_v28 = vmul.f32 %v2886_v33, %v2905_v42  ;;  %vm859_vm4 = vcmask 1048464  }
 0x298   : > { %v1024_v39 = vadd.f32 %v1020_v11, %v903_v48  ;;  %457 = vrot.lane.b32.xlu1 %v354_v35, %s2713_s29  ;;  %428 = vrot.lane.b32.xlu2 %v331_v57, %s2716_s30 }
 0x299   : > { %v415_v4 = vadd.f32 %v407_v2, %v294_v28  ;;  %v2736_v2 = vmov 22  }
 0x29a   : > { %2677 = vset.pattern.permute.xlu1 %v2736_v2  ;;  %2678 = vset.pattern.permute.xlu2 %v2736_v2 }
 0x29e   : > { %v487_v18 = vpop.permute.xlu1 %486 }
 0x29f   : > { %v491_v51 = vsel %vm405_vm0, %v3018_v58, %v487_v18  ;;  %v525_v58 = vadd.f32 %v517_v27, %v415_v4 }
 0x2a0   : > { %v499_v15 = vadd.f32 %v491_v51, %v366_v6  ;;  %v1106_v51 = vadd.f32 %v1102_v47, %v3192_v59 }
 0x2a2   : > { %538 = vrot.lane.b32.xlu2 %v499_v15, %s2718_s7  ;;  %v319_v15 = vmul.f32 %v2834_v9, %v2907_v44 }
 0x2a6   : > { %v1096_v7 = vpop.permute.xlu1 %1095 }
 0x2a7   : > { %v1101_v20 = vsel %vm405_vm0, %v1094_v24, %v1096_v7 }
 0x2a8   : > { %v1105_v11 = vadd.f32 %v1101_v20, %v1024_v39  ;;  %v318_v39 = vmul.f32 %v2837_v10, %v2907_v44  ;;  %v344_v20 = vmul.f32 %v2853_v16, %v2912_v46 }
 0x2ba   : > { %v1128_v33 = vpop.permute.xlu0 %1127 }
 0x2ca   : > { %v1126_v19 = vpop.permute.xlu2 %1125 }
 0x2d2   : > { %v3224_v31 = vpop.permute.xlu2 %563 }
 0x2d3   : > { %v570_v17 = vsel %vm405_vm0, %v3056_v43, %v3224_v31  ;;  %v1145_v43 = vpop.permute.xlu0 %1144 }
 0x2d4   : > { %v578_v41 = vadd.f32 %v570_v17, %v525_v58 }
 0x2d6   : > { %v605_v52 = vadd.f32 %v597_v29, %v578_v41 }
 0x2d8   : > { %v613_v50 = vadd.f32 %v2960_v14, %v605_v52 }
 0x2da   : > { %v1143_v62 = vpop.permute.xlu2 %1142  ;;  %v617_v36 = vmax.f32 %v613_v50, 0.0 }
 0x2db   : > { %v2667_v35 = vpop.permute.xlu0 %2666  ;;  %v1150_v6 = vsel %vm405_vm0, %v1143_v62, %v1145_v43 }
 0x2dc   : > { %v644_v61 = vpack.c.bf16 %v636_v60, %v617_v36  ;;  %v2669_v29 = vunpack.i.h.bf16 %v2667_v35  ;;  %v2668_v52 = vunpack.i.l.bf16 %v2667_v35  ;;  %v388_v36 = vmul.f32 %v2915_v49, %v2935_v54 }
 0x2de   : > { %686 = vmatpush.bf16.msra.mxu1 %v644_v61 }
 0x2e1   : > { %2336 = vmatmul.msk.bf16.vlgmr.msra.gmra.mxu1 %vm430_vm1, %v3083_v21 }
 0x2e2   : > { %v1124_v56 = vpop.permute.xlu1 %1123  ;;  %v1149_v32 = vpop.permute.xlu2 %1148 }
 0x2e3   : > { %v1132_v57 = vsel %vm1131_vm6, %v1124_v56, %v1126_v19  ;;  %v1162_v9 = vpop.permute.xlu0 %1161  ;;  %v389_v56 = vmul.f32 %v2915_v49, %v3130_v45 }
 0x2e4   : > { %v1136_v34 = vadd.f32 %v1132_v57, %v1105_v11 }
 0x2e6   : > { %v1154_v28 = vadd.f32 %v1150_v6, %v1136_v34 }
 0x2ea   : > { %v1130_v48 = vpop.permute.xlu1 %1129  ;;  %v1158_v63 = vpop.permute.xlu2 %1157 }
 0x2eb   : > { %v1133_v18 = vsel %vm1131_vm6, %v1128_v33, %v1130_v48  ;;  %v1164_v59 = vadd.f32 %v1158_v63, %v1154_v28  ;;  %v402_v6 = vpop.permute.xlu0 %401 }
 0x2ec   : > { %v1137_v24 = vadd.f32 %v1133_v18, %v1106_v51 }
 0x2ed   : > { %v1166_v33 = vmax.f32 %v1164_v59, 0.0 }
 0x2f2   : > { %v1147_v27 = vpop.permute.xlu1 %1146  ;;  %v429_v12 = vpop.permute.xlu2 %428 }
 0x2f3   : > { %v1151_v19 = vsel %vm405_vm0, %v1147_v27, %v1149_v32  ;;  %v433_v23 = vsel %vm430_vm1, %v3097_v13, %v429_v12  ;;  %v443_v4 = vadd.f32 %v429_v12, %v319_v15  ;;  %v1180_v13 = vsel %vm1131_vm6, %v2668_v52, %v2669_v29 }
 0x2f4   : > { %v1155_v58 = vadd.f32 %v1151_v19, %v1137_v24  ;;  %v442_v17 = vadd.f32 %v433_v23, %v318_v39  ;;  %v345_v32 = vmul.f32 %v2831_v8, %v2912_v46 }
 0x2f5   : > { %513 = vrot.lane.b32.xlu2 %v443_v4, %s2720_s8 }
 0x2f6   : > { %v1165_v41 = vadd.f32 %v1162_v9, %v1155_v58  ;;  %511 = vrot.lane.b32.xlu1 %v442_v17, %s2720_s8  ;;  %v2741_v58 = vmov 0.0  }
 0x2f7   : > { %273 = vst [vmem:[#allocation2] sm:$0xff] %v2741_v58 }
 0x2f8   : > { %v1167_v10 = vmax.f32 %v1165_v41, 0.0  ;;  %274 = vst [vmem:[#allocation2 + $0x8] sm:$0xff] %v2741_v58  ;;  %v404_v41 = vpop.permute.xlu0 %403 }
 0x2f9   : > { %275 = vst [vmem:[#allocation2 + $0x10] sm:$0xff] %v2741_v58  ;;  %v409_v52 = vsel %vm405_vm0, %v402_v6, %v404_v41  ;;  %v2539_v41 = vld [vmem:[%s3897_s5 + $0xb0] sm:$0xf0] }
 0x2fa   : > { %v2672_v44 = vpop.permute.xlu1 %2671  ;;  %v1184_v50 = vpack.c.bf16 %v1167_v10, %v1166_v33  ;;  %v2697_v33 = vld [vmem:[%s2828_s28 + $0x18] sm:$0xff]  ;;  %s2742_s28 = smov 42  }
 0x2fb   : > { %v2674_v7 = vunpack.i.h.bf16 %v2672_v44  ;;  %v2673_v62 = vunpack.i.l.bf16 %v2672_v44  ;;  %v296_v10 = vmul.f32 %v2697_v33, %v2905_v42 }
 0x2fc   : > { %v539_v54 = vpop.permute.xlu2 %538 }
 0x2fd   : > { %v1181_v60 = vsel %vm1131_vm6, %v2673_v62, %v2674_v7  ;;  %v543_v49 = vsel %vm540_vm2, %v3089_v26, %v539_v54  ;;  %vm849_vm2 = vcmask 736848   ;;  %vm866_vm6 = vcmask 179248  }
 0x2fe   : > { %592 = vrot.lane.b32.xlu1 %v388_v36, %s2720_s8  ;;  %v1185_v61 = vpack.c.bf16 %v1181_v60, %v1180_v13 }
 0x300   : > { %1210 = vmatpush.bf16.msra.mxu0 %v1185_v61 }
 0x302   : > { %v1199_v43 = vpop.permute.xlu1 %1198 }
 0x304   : > { %1211 = vmatpush.bf16.msra.mxu0 %v1184_v50  ;;  %v417_v50 = vadd.f32 %v409_v52, %v296_v10  ;;  %v2489_v52 = vld [vmem:[%s3897_s5 + $0x12c] sm:$0xf0] }
 0x306   : > { %594 = vrot.lane.b32.xlu1 %v389_v56, %s2720_s8 }
 0x307   : > { %2343 = vmatmul.msk.bf16.vlgmr.msra.gmra.mxu0 %vm1200_vm7, %v1199_v43 }
 0x30a   : > { %v458_v48 = vpop.permute.xlu1 %457 }
 0x30b   : > { %v462_v63 = vsel %vm405_vm0, %v3087_v25, %v458_v48  ;;  %v472_v35 = vadd.f32 %v458_v48, %v345_v32  ;;  %v2738_v25 = vmov 11  }
 0x30c   : > { %v471_v57 = vadd.f32 %v462_v63, %v344_v20  ;;  %v3269_v11 = vpop.f32.mrf.mxu0 }
 0x30d   : > { %v553_v45 = vadd.f32 %v539_v54, %v472_v35 }
 0x30e   : > { %v552_v47 = vadd.f32 %v543_v49, %v471_v57  ;;  %1190 = vperm.xlu1 %2677, %v2815_v0  }
 0x30f   : > { %567 = vrot.lane.b32.xlu0 %v553_v45, %s2713_s29 }
 0x310   : > { %565 = vrot.lane.b32.xlu2 %v552_v47, %s2713_s29 }
 0x314   : > { %v756_v46 = vpop.f32.mrf.mxu0 }
 0x317   : > { %633 = vrot.lane.b32.xlu0 %v2831_v8, %s2713_s29 }
 0x318   : > { %631 = vrot.lane.b32.xlu2 %v2853_v16, %s2713_s29  ;;  %v408_v16 = vsel %vm405_vm0, %v3152_v40, %v402_v6 }
 0x31f   : > { %1230 = vrot.lane.b32.xlu0 %v3117_v5, %s2737_s26  ;;  %s2764_s26 = smov 108  }
 0x320   : > { %1194 = vperm.xlu2 %2678, %v2929_v53   ;;  %v295_v53 = vmul.f32 %v2868_v22, %v2905_v42 }
 0x322   : > { %v416_v24 = vadd.f32 %v408_v16, %v295_v53 }
 0x327   : > { %1817 = vrot.lane.b32.xlu0 %v3083_v21, %s2739_s27 }
 0x328   : > { %2680 = vset.pattern.permute.xlu2 %v2738_v25 }
 0x329   : > { %736 = vperm.xlu2 %2680, %v2815_v0  }
 0x34f   : > { %v514_v34 = vpop.permute.xlu2 %513 }
 0x35e   : > { %v688_v26 = vpop.f32.mrf.mxu1 }
 0x35f   : > { %v689_v8 = vadd.f32 %v688_v26, %v3188_v38  ;;  %v1800_v26 = vld [vmem:[%s3895_s3 + $0x20] sm:$0xff] }
 0x361   : > { %v722_v0 = vmax.f32 %v689_v8, 0.0 }
 0x366   : > { %v690_v18 = vpop.f32.mrf.mxu1 }
 0x367   : > { %v691_v5 = vadd.f32 %v690_v18, %v3163_v55 }
 0x368   : > { %v512_v51 = vpop.permute.xlu1 %511 }
 0x369   : > { %v726_v15 = vmax.f32 %v691_v5, 0.0  ;;  %v518_v2 = vsel %vm515_vm3, %v3180_v30, %v512_v51  ;;  %v3302_v30 = vld [vmem:[%s3894_s2] sm:$0xff]  ;;  %v519_v44 = vsel %vm515_vm3, %v512_v51, %v514_v34 }
 0x36a   : > { %v566_v28 = vpop.permute.xlu2 %565  ;;  %v526_v39 = vadd.f32 %v518_v2, %v416_v24  ;;  %v527_v62 = vadd.f32 %v519_v44, %v417_v50  ;;  %v2407_v50 = vld [vmem:[%s3897_s5 + $0x78] sm:$0xf] }
 0x36b   : > { %v732_v27 = vpack.c.bf16 %v726_v15, %v722_v0  ;;  %v571_v12 = vsel %vm405_vm0, %v3224_v31, %v566_v28  ;;  %v2740_v31 = vmov 23  }
 0x36c   : > { %v579_v40 = vadd.f32 %v571_v12, %v526_v39  ;;  %2679 = vset.pattern.permute.xlu1 %v2740_v31  ;;  %v2549_v31 = vld [vmem:[%s3897_s5 + $0x100] sm:$0xf0] }
 0x36d   : > { %765 = vmatpush.bf16.msrb.mxu1 %v732_v27  ;;  %1226 = vperm.xlu1 %2679, %v3302_v30  }
 0x370   : > { %v593_v19 = vpop.permute.xlu1 %592  ;;  %2340 = vmatmul.msk.bf16.vlgmr.msrb.gmra.mxu1 %vm430_vm1, %v3197_v1 }
 0x371   : > { %v598_v22 = vsel %vm515_vm3, %v3156_v37, %v593_v19 }
 0x372   : > { %v606_v23 = vadd.f32 %v598_v22, %v579_v40  ;;  %v632_v4 = vpop.permute.xlu2 %631 }
 0x373   : > { %v637_v37 = vsel %vm405_vm0, %v3174_v3, %v632_v4 }
 0x374   : > { %v614_v59 = vadd.f32 %v2960_v14, %v606_v23 }
 0x376   : > { %v618_v17 = vmax.f32 %v614_v59, 0.0  ;;  %v2554_v59 = vld [vmem:[%s3897_s5 + $0x128] sm:$0xf0] }
 0x378   : > { %v645_v9 = vpack.c.bf16 %v637_v37, %v618_v17  ;;  %v595_v7 = vpop.permute.xlu1 %594  ;;  %v2544_v17 = vld [vmem:[%s3897_s5 + $0xd8] sm:$0xf0]  ;;  %v2427_v37 = vld [vmem:[%s3897_s5 + $0xa0] sm:$0xf] }
 0x379   : > { %v599_v61 = vsel %vm515_vm3, %v593_v19, %v595_v7  ;;  %v2428_v44 = vor.u32 %v2539_v41, %v2427_v37  ;;  %v2534_v7 = vld [vmem:[%s3897_s5 + $0x88] sm:$0xf0]  ;;  %v2540_v37 = vld [vmem:[%s3897_s5 + $0xb8] sm:$0xf0]  ;;  %v2437_v41 = vld [vmem:[%s3897_s5 + $0xbc] sm:$0xf0] }
 0x37a   : > { %700 = vmatpush.bf16.msra.mxu2 %v645_v9  ;;  %v1195_v29 = vpop.permute.xlu2 %1194  ;;  %vm854_vm3 = vcmask 900848  }
 0x37d   : > { %2337 = vmatmul.msk.bf16.vlgmr.msra.gmra.mxu2 %vm430_vm1, %v3083_v21 }
 0x380   : > { %v1191_v20 = vpop.permute.xlu1 %1190 }
 0x381   : > { %v568_v3 = vpop.permute.xlu0 %567 }
 0x382   : > { %v572_v13 = vsel %vm405_vm0, %v566_v28, %v568_v3  ;;  %v2408_v3 = vor.u32 %v2534_v7, %v2407_v50  ;;  %v2463_v50 = vld [vmem:[%s3897_s5 + $0xd8] sm:$0xf]  ;;  %v2546_v7 = vld [vmem:[%s3897_s5 + $0xe8] sm:$0xf0] }
 0x383   : > { %v580_v36 = vadd.f32 %v572_v13, %v527_v62  ;;  %v3315_v60 = vpop.permute.xlu2 %736  ;;  %v2547_v62 = vld [vmem:[%s3897_s5 + $0xf4] sm:$0xf]  ;;  %v2469_v13 = vld [vmem:[%s3897_s5 + $0x104] sm:$0xf0] }
 0x384   : > { %v755_v43 = vadd.f32 %v3269_v11, %v3315_v60  ;;  %v1213_v42 = vpop.f32.mrf.mxu0 }
 0x385   : > { %v607_v56 = vadd.f32 %v599_v61, %v580_v36  ;;  %v1214_v57 = vadd.f32 %v1213_v42, %v1191_v20  ;;  %v2387_v36 = vld [vmem:[%s3897_s5 + $0x50] sm:$0xf]  ;;  %v2529_v61 = vld [vmem:[%s3897_s5 + $0x60] sm:$0xf0]  ;;  %v2542_v42 = vld [vmem:[%s3897_s5 + $0xcc] sm:$0xf] }
 0x386   : > { %v797_v32 = vmax.f32 %v755_v43, 0.0  ;;  %v2472_v43 = vor.u32 %v2547_v62, %v2469_v13  ;;  %v2388_v20 = vor.u32 %v2529_v61, %v2387_v36  ;;  %v2415_v36 = vld [vmem:[%s3897_s5 + $0x80] sm:$0xf]  ;;  %v2535_v61 = vld [vmem:[%s3897_s5 + $0x90] sm:$0xf0] }
 0x387   : > { %v615_v54 = vadd.f32 %v2960_v14, %v607_v56  ;;  %v1218_v46 = vmax.f32 %v1214_v57, 0.0  ;;  %v1798_v14 = vld [vmem:[%s3895_s3 + $0x8] sm:$0xff]  ;;  %v2449_v56 = vld [vmem:[%s3897_s5 + $0xdc] sm:$0xf0]  ;;  %v2537_v57 = vld [vmem:[%s3897_s5 + $0xa4] sm:$0xf] }
 0x388   : > { %802 = vrot.lane.b32.xlu2 %v797_v32, %s2742_s28  ;;  %v1802_v34 = vpack.c.bf16 %v1800_v26, %v1798_v14  ;;  %v2497_v14 = vld [vmem:[%s3897_s5 + $0x134] sm:$0xf0] }
 0x389   : > { %v634_v48 = vpop.permute.xlu0 %633  ;;  %v619_v63 = vmax.f32 %v615_v54, 0.0 }
 0x38a   : > { %v638_v35 = vsel %vm405_vm0, %v632_v4, %v634_v48  ;;  %1819 = vrot.lane.b32.xlu1 %v1802_v34, %s2739_s27  ;;  %v2487_v4 = vld [vmem:[%s3897_s5 + $0x118] sm:$0xf]  ;;  %v2452_v48 = vor.u32 %v2542_v42, %v2449_v56  ;;  %v2519_v34 = vld [vmem:[%s3897_s5 + $0x10] sm:$0xf0]  ;;  %v2533_v42 = vld [vmem:[%s3897_s5 + $0x84] sm:$0xf] }
 0x38b   : > { %v646_v49 = vpack.c.bf16 %v638_v35, %v619_v63  ;;  %v2367_v63 = vld [vmem:[%s3897_s5 + $0x28] sm:$0xf]  ;;  %v2524_v35 = vld [vmem:[%s3897_s5 + $0x38] sm:$0xf0]  ;;  %v2417_v56 = vld [vmem:[%s3897_s5 + $0x94] sm:$0xf0] }
 0x38c   : > { %v1215_v45 = vpop.f32.mrf.mxu0  ;;  %v2368_v26 = vor.u32 %v2524_v35, %v2367_v63  ;;  %v2464_v63 = vor.u32 %v2546_v7, %v2463_v50  ;;  %v2517_v35 = vld [vmem:[%s3897_s5 + $0x4] sm:$0xf]  ;;  %vm826_vm0 = vcmask 1048528  }
 0x38d   : > { %v1216_v47 = vadd.f32 %v1215_v45, %v1195_v29  ;;  %714 = vmatpush.bf16.msra.mxu3 %v646_v49  ;;  %v2552_v29 = vld [vmem:[%s3897_s5 + $0x11c] sm:$0xf]  ;;  %v2429_v49 = vld [vmem:[%s3897_s5 + $0xb4] sm:$0xf0]  ;;  %v2495_v45 = vld [vmem:[%s3897_s5 + $0x120] sm:$0xf] }
 0x38e   : > { %v2492_v10 = vor.u32 %v2552_v29, %v2489_v52 }
 0x38f   : > { %v1219_v25 = vmax.f32 %v1216_v47, 0.0  ;;  %v2555_v47 = vld [vmem:[%s3897_s5 + $0x130] sm:$0xf0] }
 0x390   : > { %2338 = vmatmul.msk.bf16.vlgmr.msra.gmra.mxu3 %vm430_vm1, %v3083_v21 }
 0x391   : > { %v1222_v11 = vpack.c.bf16 %v1219_v25, %v1218_v46  ;;  %v1231_v8 = vpop.permute.xlu0 %1230  ;;  %v2347_v46 = vld [vmem:[%s3897_s5] sm:$0xf]  ;;  %v2496_v25 = vor.u32 %v2555_v47, %v2495_v45  ;;  %v2443_v47 = vld [vmem:[%s3897_s5 + $0xb0] sm:$0xf] }
 0x393   : > { %1242 = vmatpush.bf16.msra.mxu1 %v1222_v11  ;;  %v2553_v11 = vld [vmem:[%s3897_s5 + $0x124] sm:$0xf]  ;;  %1532 = vmatpush.bf16.msrb.mxu0 %v2496_v25  ;;  %v2416_v25 = vor.u32 %v2535_v61, %v2415_v36 }
 0x396   : > { %2344 = vmatmul.msk.bf16.vlgmr.msra.gmra.mxu1 %vm430_vm1, %v1231_v8  ;;  %v2409_v8 = vld [vmem:[%s3897_s5 + $0x8c] sm:$0xf0] }
 0x399   : > { %v3400_v54 = vpop.permute.xlu0 %1817 }
 0x3df   : > { %v3372_v33 = vpop.permute.xlu1 %1226 }
 0x3e2   : > { %v803_v6 = vpop.permute.xlu2 %802 }
 0x3e3   : > { %806 = vst.msk [vmem:[#allocation2] sm:$0xff] %vm805_vm8, %v803_v6  ;;  %v2532_v6 = vld [vmem:[%s3897_s5 + $0x7c] sm:$0xf]  ;;  %vm872_vm8 = vcmask 343248  }
 0x3ed   : > { %v767_v21 = vpop.f32.mrf.mxu1 }
 0x3ee   : > { %v768_v18 = vadd.f32 %v767_v21, %v3315_v60  ;;  %v2500_v21 = vor.u32 %v2553_v11, %v2497_v14  ;;  %v2420_v11 = vor.u32 %v2533_v42, %v2417_v56 }
 0x3f0   : > { %v798_v16 = vmax.f32 %v768_v18, 0.0  ;;  %v2432_v18 = vor.u32 %v2537_v57, %v2429_v49  ;;  %1545 = vmatpush.bf16.msrb.mxu1 %v2500_v21 }
 0x3f2   : > { %830 = vrot.lane.b32.xlu1 %v798_v16, %s2743_s11  ;;  %823 = vrot.lane.b32.xlu0 %v798_v16, %s2744_s12  ;;  %s2752_s11 = smov 38   ;;  %s2753_s12 = smov 50  }
 0x3f3   : > { %840 = vrot.lane.b32.xlu2 %v798_v16, %s2745_s13 }
 0x3f5   : > { %v769_v5 = vpop.f32.mrf.mxu1 }
 0x3f6   : > { %v2550_v5 = vld [vmem:[%s3897_s5 + $0x108] sm:$0xf0] }
 0x3fa   : > { %835 = vrot.lane.b32.xlu0 %v798_v16, %s2746_s14  ;;  %807 = vrot.lane.b32.xlu1 %v797_v32, %s2747_s15  ;;  %v2475_v16 = vld [vmem:[%s3897_s5 + $0xf8] sm:$0xf]  ;;  %s2754_s14 = smov 26   ;;  %s2755_s15 = smov 14  }
 0x3fb   : > { %817 = vrot.lane.b32.xlu2 %v797_v32, %s2748_s16  ;;  %s2756_s16 = smov 2  }
 0x400   : > { %v702_v53 = vpop.f32.mrf.mxu2 }
 0x401   : > { %v703_v51 = vadd.f32 %v702_v53, %v3188_v38  ;;  %v2548_v53 = vld [vmem:[%s3897_s5 + $0xfc] sm:$0xf] }
 0x402   : > { %812 = vrot.lane.b32.xlu0 %v797_v32, %s2749_s17  ;;  %v3398_v32 = vpop.permute.xlu1 %1819  ;;  %s2757_s17 = smov 118  }
 0x403   : > { %v723_v2 = vmax.f32 %v703_v51, 0.0  ;;  %v2503_v51 = vld [vmem:[%s3897_s5 + $0x128] sm:$0xf] }
 0x408   : > { %v704_v0 = vpop.f32.mrf.mxu2 }
 0x409   : > { %v705_v15 = vadd.f32 %v704_v0, %v3163_v55  ;;  %v2556_v0 = vld [vmem:[%s3897_s5 + $0x138] sm:$0xf0] }
 0x40b   : > { %v727_v24 = vmax.f32 %v705_v15, 0.0  ;;  %v2476_v15 = vor.u32 %v2550_v5, %v2475_v16 }
 0x40d   : > { %v733_v28 = vpack.c.bf16 %v727_v24, %v723_v2  ;;  %v2477_v2 = vld [vmem:[%s3897_s5 + $0x10c] sm:$0xf0]  ;;  %1533 = vmatpush.bf16.msrb.mxu0 %v2476_v15 }
 0x40e   : > { %v2480_v24 = vor.u32 %v2548_v53, %v2477_v2  ;;  %v2395_v53 = vld [vmem:[%s3897_s5 + $0x58] sm:$0xf]  ;;  %v2397_v2 = vld [vmem:[%s3897_s5 + $0x6c] sm:$0xf0] }
 0x40f   : > { %778 = vmatpush.bf16.msrb.mxu2 %v733_v28  ;;  %v2455_v28 = vld [vmem:[%s3897_s5 + $0xd0] sm:$0xf] }
 0x410   : > { %1546 = vmatpush.bf16.msrb.mxu1 %v2480_v24  ;;  %v2403_v24 = vld [vmem:[%s3897_s5 + $0x60] sm:$0xf] }
 0x412   : > { %2341 = vmatmul.msk.bf16.vlgmr.msrb.gmra.mxu2 %vm430_vm1, %v3197_v1 }
 0x413   : > { %v716_v27 = vpop.f32.mrf.mxu3  ;;  %v1244_v13 = vpop.f32.mrf.mxu1 }
 0x414   : > { %v717_v39 = vadd.f32 %v716_v27, %v3188_v38  ;;  %v2467_v38 = vld [vmem:[%s3897_s5 + $0xf0] sm:$0xf]  ;;  %v2348_v27 = vor.u32 %v2519_v34, %v2347_v46  ;;  %v2541_v46 = vld [vmem:[%s3897_s5 + $0xc0] sm:$0xf0] }
 0x415   : > { %v2468_v58 = vor.u32 %v2549_v31, %v2467_v38  ;;  %v2551_v31 = vld [vmem:[%s3897_s5 + $0x110] sm:$0xf0]  ;;  %v2444_v34 = vor.u32 %v2541_v46, %v2443_v47 }
 0x416   : > { %v724_v19 = vmax.f32 %v717_v39, 0.0  ;;  %v2545_v39 = vld [vmem:[%s3897_s5 + $0xe0] sm:$0xf0] }
 0x41b   : > { %v718_v12 = vpop.f32.mrf.mxu3  ;;  %v1246_v21 = vpop.f32.mrf.mxu1 }
 0x41c   : > { %v719_v40 = vadd.f32 %v718_v12, %v3163_v55  ;;  %v2488_v55 = vor.u32 %v2554_v59, %v2487_v4  ;;  %v2543_v12 = vld [vmem:[%s3897_s5 + $0xd4] sm:$0xf]  ;;  %v2389_v4 = vld [vmem:[%s3897_s5 + $0x64] sm:$0xf0]  ;;  %v2483_v59 = vld [vmem:[%s3897_s5 + $0x100] sm:$0xf] }
 0x41d   : > { %v2484_v52 = vor.u32 %v2551_v31, %v2483_v59  ;;  %v2526_v59 = vld [vmem:[%s3897_s5 + $0x48] sm:$0xf0]  ;;  %v2355_v31 = vld [vmem:[%s3897_s5 + $0x8] sm:$0xf] }
 0x41e   : > { %v728_v22 = vmax.f32 %v719_v40, 0.0  ;;  %1506 = vmatpush.bf16.msra.mxu2 %v2488_v55  ;;  %v2457_v40 = vld [vmem:[%s3897_s5 + $0xe4] sm:$0xf0] }
 0x420   : > { %v734_v23 = vpack.c.bf16 %v728_v22, %v724_v19  ;;  %v2412_v19 = vor.u32 %v2532_v6, %v2409_v8  ;;  %v2504_v22 = vor.u32 %v2556_v0, %v2503_v51  ;;  %v2423_v6 = vld [vmem:[%s3897_s5 + $0x88] sm:$0xf]  ;;  %v2536_v8 = vld [vmem:[%s3897_s5 + $0x98] sm:$0xf0]  ;;  %v2530_v51 = vld [vmem:[%s3897_s5 + $0x68] sm:$0xf0] }
 0x421   : > { %v2528_v0 = vld [vmem:[%s3897_s5 + $0x5c] sm:$0xf]  ;;  %v2396_v15 = vor.u32 %v2530_v51, %v2395_v53 }
 0x422   : > { %791 = vmatpush.bf16.msrb.mxu3 %v734_v23  ;;  %1507 = vmatpush.bf16.msra.mxu2 %v2468_v58  ;;  %v2527_v23 = vld [vmem:[%s3897_s5 + $0x54] sm:$0xf]  ;;  %v2456_v58 = vor.u32 %v2545_v39, %v2455_v28 }
 0x423   : > { %v2392_v29 = vor.u32 %v2527_v23, %v2389_v4  ;;  %v2531_v28 = vld [vmem:[%s3897_s5 + $0x70] sm:$0xf0]  ;;  %v2377_v23 = vld [vmem:[%s3897_s5 + $0x44] sm:$0xf0]  ;;  %v2383_v4 = vld [vmem:[%s3897_s5 + $0x38] sm:$0xf] }
 0x424   : > { %1534 = vmatpush.bf16.msrb.mxu0 %v2456_v58  ;;  %v2404_v39 = vor.u32 %v2531_v28, %v2403_v24  ;;  %v2520_v58 = vld [vmem:[%s3897_s5 + $0x18] sm:$0xf0] }
 0x425   : > { %2342 = vmatmul.msk.bf16.vlgmr.msrb.gmra.mxu3 %vm430_vm1, %v3197_v1  ;;  %v2447_v1 = vld [vmem:[%s3897_s5 + $0xc8] sm:$0xf] }
 0x426   : > { %v2448_v9 = vor.u32 %v2544_v17, %v2447_v1  ;;  %1519 = vmatpush.bf16.msra.mxu3 %v2492_v10  ;;  %v2460_v1 = vor.u32 %v2543_v12, %v2457_v40  ;;  %v2435_v17 = vld [vmem:[%s3897_s5 + $0xa8] sm:$0xf]  ;;  %v2522_v10 = vld [vmem:[%s3897_s5 + $0x2c] sm:$0xf]  ;;  %v2375_v12 = vld [vmem:[%s3897_s5 + $0x30] sm:$0xf] }
 0x427   : > { %v2436_v62 = vor.u32 %v2540_v37, %v2435_v17  ;;  %v2525_v40 = vld [vmem:[%s3897_s5 + $0x40] sm:$0xf0]  ;;  %v2357_v17 = vld [vmem:[%s3897_s5 + $0x1c] sm:$0xf0]  ;;  %v2363_v37 = vld [vmem:[%s3897_s5 + $0x10] sm:$0xf] }
 0x428   : > { %1508 = vmatpush.bf16.msra.mxu2 %v2448_v9  ;;  %v2538_v9 = vld [vmem:[%s3897_s5 + $0xac] sm:$0xf]  ;;  %1547 = vmatpush.bf16.msrb.mxu1 %v2460_v1 }
 0x429   : > { %1535 = vmatpush.bf16.msrb.mxu0 %v2436_v62  ;;  %v2518_v1 = vld [vmem:[%s3897_s5 + $0xc] sm:$0xf] }
 0x42a   : > { %1520 = vmatpush.bf16.msra.mxu3 %v2472_v43  ;;  %v1245_v43 = vadd.f32 %v1244_v13, %v3372_v33  ;;  %v2349_v33 = vld [vmem:[%s3897_s5 + $0x14] sm:$0xf0] }
 0x42c   : > { %1509 = vmatpush.bf16.msra.mxu2 %v2428_v44  ;;  %v2369_v44 = vld [vmem:[%s3897_s5 + $0x3c] sm:$0xf0]  ;;  %v1248_v45 = vmax.f32 %v1245_v43, 0.0 }
 0x42d   : > { %1536 = vmatpush.bf16.msrb.mxu0 %v2416_v25 }
 0x42e   : > { %1521 = vmatpush.bf16.msra.mxu3 %v2452_v48  ;;  %v2372_v48 = vor.u32 %v2522_v10, %v2369_v44  ;;  %v1249_v14 = vpack.c.bf16 %v1248_v45, %v1248_v45 }
 0x430   : > { %1510 = vmatpush.bf16.msra.mxu2 %v2408_v3  ;;  %v2440_v3 = vor.u32 %v2538_v9, %v2437_v41  ;;  %v2521_v9 = vld [vmem:[%s3897_s5 + $0x20] sm:$0xf0]  ;;  %v2356_v41 = vor.u32 %v2520_v58, %v2355_v31 }
 0x431   : > { %1537 = vmatpush.bf16.msrb.mxu0 %v2396_v15 }
 0x432   : > { %1522 = vmatpush.bf16.msra.mxu3 %v2432_v18  ;;  %1548 = vmatpush.bf16.msrb.mxu1 %v2440_v3  ;;  %v2424_v18 = vor.u32 %v2536_v8, %v2423_v6 }
 0x434   : > { %1511 = vmatpush.bf16.msra.mxu2 %v2388_v20 }
 0x436   : > { %1523 = vmatpush.bf16.msra.mxu3 %v2412_v19  ;;  %1549 = vmatpush.bf16.msrb.mxu1 %v2420_v11  ;;  %v2523_v19 = vld [vmem:[%s3897_s5 + $0x34] sm:$0xf] }
 0x438   : > { %1512 = vmatpush.bf16.msra.mxu2 %v2368_v26  ;;  %v2352_v26 = vor.u32 %v2517_v35, %v2349_v33 }
 0x43a   : > { %1524 = vmatpush.bf16.msra.mxu3 %v2392_v29  ;;  %v2360_v29 = vor.u32 %v2518_v1, %v2357_v17 }
 0x43c   : > { %1513 = vmatpush.bf16.msra.mxu2 %v2348_v27  ;;  %v2400_v27 = vor.u32 %v2528_v0, %v2397_v2 }
 0x43e   : > { %1525 = vmatpush.bf16.msra.mxu3 %v2372_v48  ;;  %1550 = vmatpush.bf16.msrb.mxu1 %v2400_v27 }
 0x43f   : > { %1514 = vmatmul.bf16.vlgmr.msra.gmra.mxu2 %v1249_v14 }
 0x440   : > { %1558 = vmatpush.bf16.msrb.mxu2 %v2504_v22  ;;  %v2376_v22 = vor.u32 %v2525_v40, %v2375_v12 }
 0x442   : > { %1526 = vmatpush.bf16.msra.mxu3 %v2352_v26  ;;  %1538 = vmatpush.bf16.msrb.mxu0 %v2376_v22 }
 0x444   : > { %1559 = vmatpush.bf16.msrb.mxu2 %v2484_v52  ;;  %v2364_v52 = vor.u32 %v2521_v9, %v2363_v37 }
 0x445   : > { %1527 = vmatmul.bf16.vlgmr.msra.gmra.mxu3 %v1249_v14 }
 0x446   : > { %1539 = vmatpush.bf16.msrb.mxu0 %v2356_v41 }
 0x448   : > { %1560 = vmatpush.bf16.msrb.mxu2 %v2464_v63 }
 0x449   : > { %1540 = vmatmul.bf16.vlgmr.msrb.gmra.mxu0 %v1249_v14 }
 0x44c   : > { %1561 = vmatpush.bf16.msrb.mxu2 %v2444_v34 }
 0x44d   : > { %v841_v20 = vpop.permute.xlu2 %840 }
 0x450   : > { %1562 = vmatpush.bf16.msrb.mxu2 %v2424_v18 }
 0x454   : > { %1563 = vmatpush.bf16.msrb.mxu2 %v2404_v39 }
 0x455   : > { %v818_v5 = vpop.permute.xlu2 %817 }
 0x464   : > { %v831_v38 = vpop.permute.xlu1 %830  ;;  %v3477_v55 = vpop.permute.xlu0 %823 }
 0x465   : > { %829 = vst.msk [vmem:[#allocation2 + $0x8] sm:$0xff] %vm828_vm9, %v3477_v55  ;;  %vm877_vm9 = vcmask 507248  }
 0x466   : > { %834 = vst.msk [vmem:[#allocation2 + $0x8] sm:$0xff] %vm833_vm10, %v831_v38  ;;  %v2380_v38 = vor.u32 %v2523_v19, %v2377_v23  ;;  %vm882_vm10 = vcmask 671248   ;;  %v2765_v23 = vmov 0.0|0.0  }
 0x468   : > { %1551 = vmatpush.bf16.msrb.mxu1 %v2380_v38 }
 0x46c   : > { %v836_v57 = vpop.permute.xlu0 %835  ;;  %v808_v49 = vpop.permute.xlu1 %807  ;;  %1552 = vmatpush.bf16.msrb.mxu1 %v2360_v29 }
 0x46d   : > { %839 = vst.msk [vmem:[#allocation2 + $0x8] sm:$0xff] %vm838_vm11, %v836_v57  ;;  %vm887_vm11 = vcmask 835248  }
 0x46e   : > { %811 = vst.msk [vmem:[#allocation2] sm:$0xff] %vm810_vm12, %v808_v49  ;;  %vm1769_vm12 = vcmask 711680  }
 0x46f   : > { %844 = vst.msk [vmem:[#allocation2 + $0x8] sm:$0xff] %vm843_vm13, %v841_v20  ;;  %1553 = vmatmul.bf16.vlgmr.msrb.gmra.mxu1 %v1249_v14  ;;  %vm1750_vm13 = vcmask 719872  }
 0x474   : > { %v813_v16 = vpop.permute.xlu0 %812 }
 0x475   : > { %816 = vst.msk [vmem:[#allocation2] sm:$0xff] %vm815_vm14, %v813_v16  ;;  %vm1731_vm14 = vcmask 867328  }
 0x476   : > { %821 = vst.msk [vmem:[#allocation2] sm:$0xff] %vm820_vm15, %v818_v5  ;;  %vm1712_vm15 = vcmask 875520  }
 0x477   : > { %827 = vst.msk [vmem:[#allocation2] sm:$0xff] %vm826_vm0, %v3477_v55  ;;  %v2384_v55 = vor.u32 %v2526_v59, %v2383_v4  ;;  %v1634_v4 = vunpack.c.l.b16 %v2765_v23  ;;  %vm1693_vm0 = vcmask 883712  }
 0x479   : > { %1564 = vmatpush.bf16.msrb.mxu2 %v2384_v55 }
 0x47d   : > { %1565 = vmatpush.bf16.msrb.mxu2 %v2364_v52 }
 0x47e   : > { %v1588_v15 = vld [vmem:[#allocation2] sm:$0xff] }
 0x480   : > { %1566 = vmatmul.bf16.vlgmr.msrb.gmra.mxu2 %v1249_v14 }
 0x495   : > { %v780_v10 = vpop.f32.mrf.mxu2 }
 0x496   : > { %v781_v44 = vadd.f32 %v780_v10, %v3315_v60 }
 0x498   : > { %v799_v50 = vmax.f32 %v781_v44, 0.0 }
 0x49a   : > { %851 = vrot.lane.b32.xlu0 %v799_v50, %s2750_s9  ;;  %846 = vrot.lane.b32.xlu1 %v799_v50, %s2751_s10  ;;  %s2767_s9 = smov 32  }
 0x49b   : > { %863 = vrot.lane.b32.xlu2 %v799_v50, %s2752_s11 }
 0x49d   : > { %v782_v7 = vpop.f32.mrf.mxu2 }
 0x4a2   : > { %856 = vrot.lane.b32.xlu1 %v799_v50, %s2753_s12 }
 0x4a8   : > { %v793_v62 = vpop.f32.mrf.mxu3 }
 0x4a9   : > { %v794_v3 = vadd.f32 %v793_v62, %v3315_v60 }
 0x4ab   : > { %v800_v13 = vmax.f32 %v794_v3, 0.0 }
 0x4ad   : > { %869 = vrot.lane.b32.xlu0 %v800_v13, %s2754_s14  ;;  %874 = vrot.lane.b32.xlu1 %v800_v13, %s2755_s15  ;;  %s2559_s14 = smul.u32 24, %s3900_s22 }
 0x4ae   : > { %879 = vrot.lane.b32.xlu2 %v800_v13, %s2756_s16 }
 0x4b0   : > { %v795_v36 = vpop.f32.mrf.mxu3 }
 0x4b5   : > { %884 = vrot.lane.b32.xlu0 %v800_v13, %s2757_s17  ;;  %s3884_s17 = scalar_lea.vmem %s3898_s6, %s2559_s14 }
 0x4c2   : > { %v1515_v61 = vpop.f32.mrf.mxu2 }
 0x4c6   : > { %v1541_v48 = vpop.f32.mrf.mxu0 }
 0x4c8   : > { %v1528_v43 = vpop.f32.mrf.mxu3 }
 0x4c9   : > { %v3599_v42 = vpack.c.bf16 %v1528_v43, %v1515_v61 }
 0x4ca   : > { %v1517_v56 = vpop.f32.mrf.mxu2 }
 0x4cb   : > { %v1635_v28 = vunpack.c.l.b16 %v3599_v42  ;;  %v1636_v12 = vunpack.c.h.b16 %v3599_v42 }
 0x4ce   : > { %v1543_v35 = vpop.f32.mrf.mxu0 }
 0x4d0   : > { %v1530_v20 = vpop.f32.mrf.mxu3 }
 0x4ec   : > { %v1554_v63 = vpop.f32.mrf.mxu1 }
 0x4ed   : > { %v1602_v34 = vpack.c.bf16 %v1554_v63, %v1541_v48 }
 0x4ef   : > { %v1638_v21 = vunpack.c.h.b16 %v1602_v34  ;;  %v1637_v18 = vunpack.c.l.b16 %v1602_v34 }
 0x4f4   : > { %v1556_v49 = vpop.f32.mrf.mxu1 }
 0x4f5   : > { %v864_v46 = vpop.permute.xlu2 %863 }
 0x503   : > { %v3601_v60 = vpop.f32.mrf.mxu2 }
 0x504   : > { %v1603_v19 = vpack.c.bf16 %v3601_v60, %v3601_v60 }
 0x506   : > { %v1639_v22 = vunpack.c.l.b16 %v1603_v19 }
 0x508   : > { %v880_v14 = vpop.permute.xlu2 %879  ;;  %v1644_v59 = vpack.c.b16 %v1639_v22, %v1634_v4 }
 0x50b   : > { %v1569_v45 = vpop.f32.mrf.mxu2 }
 0x50c   : > { %v852_v33 = vpop.permute.xlu0 %851  ;;  %v847_v57 = vpop.permute.xlu1 %846 }
 0x50d   : > { %850 = vst.msk [vmem:[#allocation2 + $0x8] sm:$0xff] %vm849_vm2, %v847_v57  ;;  %vm1674_vm2 = vcmask 1031168  }
 0x50e   : > { %855 = vst.msk [vmem:[#allocation2 + $0x8] sm:$0xff] %vm854_vm3, %v852_v33  ;;  %vm1788_vm3 = vcmask 703488  }
 0x514   : > { %v857_v47 = vpop.permute.xlu1 %856 }
 0x515   : > { %860 = vst.msk [vmem:[#allocation2 + $0x8] sm:$0xff] %vm859_vm4, %v857_v47  ;;  %vm1655_vm4 = vcmask 1039360  }
 0x516   : > { %862 = vst.msk [vmem:[#allocation2 + $0x10] sm:$0xff] %vm861_vm5, %v857_v47  ;;  %v2766_v47 = vmov 24   ;;  %vm1821_vm5 = vcmask 392192  }
 0x517   : > { %867 = vst.msk [vmem:[#allocation2 + $0x10] sm:$0xff] %vm866_vm6, %v864_v46  ;;  %2681 = vset.pattern.permute.xlu1 %v2766_v47  ;;  %2682 = vset.pattern.permute.xlu2 %v2766_v47 }
 0x51c   : > { %v1589_v0 = vld [vmem:[#allocation2 + $0x8] sm:$0xff] }
 0x51d   : > { %v1598_v2 = vpack.c.bf16 %v1589_v0, %v1588_v15 }
 0x51f   : > { %v870_v25 = vpop.permute.xlu0 %869  ;;  %v875_v11 = vpop.permute.xlu1 %874  ;;  %v1630_v24 = vunpack.c.l.b16 %v1598_v2  ;;  %v1631_v39 = vunpack.c.h.b16 %v1598_v2  ;;  %v1822_v2 = vsel %vm1821_vm5, %v3400_v54, %v3398_v32 }
 0x520   : > { %873 = vst.msk [vmem:[#allocation2 + $0x10] sm:$0xff] %vm872_vm8, %v870_v25 }
 0x521   : > { %878 = vst.msk [vmem:[#allocation2 + $0x10] sm:$0xff] %vm877_vm9, %v875_v11  ;;  %v3620_v27 = vpack.c.b16 %v1635_v28, %v1630_v24  ;;  %v3629_v40 = vpack.c.b16 %v1636_v12, %v1631_v39 }
 0x522   : > { %883 = vst.msk [vmem:[#allocation2 + $0x10] sm:$0xff] %vm882_vm10, %v880_v14 }
 0x527   : > { %v885_v26 = vpop.permute.xlu0 %884 }
 0x528   : > { %888 = vst.msk [vmem:[#allocation2 + $0x10] sm:$0xff] %vm887_vm11, %v885_v26 }
 0x52f   : > { %v1590_v6 = vld [vmem:[#allocation2 + $0x10] sm:$0xff] }
 0x530   : > { %v1599_v8 = vpack.c.bf16 0.0, %v1590_v6 }
 0x532   : > { %v1633_v16 = vunpack.c.h.b16 %v1599_v8  ;;  %v1632_v5 = vunpack.c.l.b16 %v1599_v8 }
 0x534   : > { %v3603_v53 = vpack.c.b16 %v1638_v21, %v1633_v16  ;;  %v3605_v51 = vpack.c.b16 %v1637_v18, %v1632_v5 }
 0x536   : > { %1765 = vrot.lane.b32.xlu0 %v3603_v53, %s2758_s18  ;;  %1668 = vrot.lane.b32.xlu1 %v3605_v51, %s2759_s19 }
 0x537   : > { %1763 = vrot.lane.b32.xlu2 %v3605_v51, %s2758_s18 }
 0x53e   : > { %1746 = vrot.lane.b32.xlu0 %v3603_v53, %s2760_s20  ;;  %1649 = vrot.lane.b32.xlu1 %v3605_v51, %s2761_s23 }
 0x53f   : > { %1744 = vrot.lane.b32.xlu2 %v3605_v51, %s2760_s20 }
 0x546   : > { %1727 = vrot.lane.b32.xlu0 %v3603_v53, %s2762_s24  ;;  %1759 = vrot.lane.b32.xlu1 %v3620_v27, %s2758_s18 }
 0x547   : > { %1725 = vrot.lane.b32.xlu2 %v3605_v51, %s2762_s24 }
 0x54e   : > { %1740 = vrot.lane.b32.xlu0 %v3620_v27, %s2760_s20  ;;  %1742 = vrot.lane.b32.xlu1 %v3629_v40, %s2760_s20 }
 0x54f   : > { %1706 = vrot.lane.b32.xlu2 %v3605_v51, %s2763_s25 }
 0x556   : > { %1721 = vrot.lane.b32.xlu0 %v3620_v27, %s2762_s24  ;;  %1723 = vrot.lane.b32.xlu1 %v3629_v40, %s2762_s24 }
 0x557   : > { %1687 = vrot.lane.b32.xlu2 %v3605_v51, %s2764_s26 }
 0x55e   : > { %1702 = vrot.lane.b32.xlu0 %v3620_v27, %s2763_s25  ;;  %1704 = vrot.lane.b32.xlu1 %v3629_v40, %s2763_s25 }
 0x55f   : > { %1708 = vrot.lane.b32.xlu2 %v3603_v53, %s2763_s25 }
 0x566   : > { %1778 = vrot.lane.b32.xlu0 %v3620_v27, %s2745_s13  ;;  %1683 = vrot.lane.b32.xlu1 %v3620_v27, %s2764_s26 }
 0x567   : > { %1689 = vrot.lane.b32.xlu2 %v3603_v53, %s2764_s26 }
 0x56e   : > { %1767 = vrot.lane.b32.xlu0 %v1644_v59, %s2758_s18  ;;  %1780 = vrot.lane.b32.xlu1 %v3629_v40, %s2745_s13 }
 0x56f   : > { %1761 = vrot.lane.b32.xlu2 %v3629_v40, %s2758_s18 }
 0x576   : > { %1748 = vrot.lane.b32.xlu0 %v1644_v59, %s2760_s20  ;;  %1664 = vrot.lane.b32.xlu1 %v3620_v27, %s2759_s19 }
 0x577   : > { %1685 = vrot.lane.b32.xlu2 %v3629_v40, %s2764_s26 }
 0x57e   : > { %1729 = vrot.lane.b32.xlu0 %v1644_v59, %s2762_s24  ;;  %1645 = vrot.lane.b32.xlu1 %v3620_v27, %s2761_s23 }
 0x57f   : > { %1666 = vrot.lane.b32.xlu2 %v3629_v40, %s2759_s19 }
 0x586   : > { %1670 = vrot.lane.b32.xlu0 %v3603_v53, %s2759_s19  ;;  %1710 = vrot.lane.b32.xlu1 %v1644_v59, %s2763_s25 }
 0x587   : > { %1647 = vrot.lane.b32.xlu2 %v3629_v40, %s2761_s23 }
 0x58e   : > { %1672 = vrot.lane.b32.xlu0 %v1644_v59, %s2759_s19  ;;  %1691 = vrot.lane.b32.xlu1 %v1644_v59, %s2764_s26 }
 0x58f   : > { %1782 = vrot.lane.b32.xlu2 %v3605_v51, %s2745_s13 }
 0x591   : > { %v1764_v38 = vpop.permute.xlu2 %1763 }
 0x596   : > { %1786 = vrot.lane.b32.xlu0 %v1644_v59, %s2745_s13  ;;  %1653 = vrot.lane.b32.xlu1 %v1644_v59, %s2761_s23  ;;  %v1804_v59 = vld [vmem:[%s3894_s2 + $0x8] sm:$0xff] }
 0x597   : > { %1651 = vrot.lane.b32.xlu2 %v3603_v53, %s2761_s23 }
 0x599   : > { %v1745_v55 = vpop.permute.xlu2 %1744 }
 0x59e   : > { %1807 = vperm.xlu1 %2681, %v3302_v30  }
 0x59f   : > { %1784 = vrot.lane.b32.xlu2 %v3603_v53, %s2745_s13 }
 0x5a1   : > { %v1726_v31 = vpop.permute.xlu2 %1725 }
 0x5a7   : > { %1812 = vperm.xlu2 %2682, %v1804_v59  }
 0x5a8   : > { %v3687_v58 = vpop.permute.xlu0 %1765  ;;  %v3689_v1 = vpop.permute.xlu1 %1668 }
 0x5a9   : > { %v1772_v17 = vsel %vm1769_vm12, %v1764_v38, %v3687_v58  ;;  %v1707_v37 = vpop.permute.xlu2 %1706 }
 0x5aa   : > { %1883 = vmatpush.bf16.msra.mxu2 %v1772_v17 }
 0x5b0   : > { %v3693_v9 = vpop.permute.xlu0 %1746  ;;  %v3695_v41 = vpop.permute.xlu1 %1649 }
 0x5b1   : > { %v1688_v29 = vpop.permute.xlu2 %1687  ;;  %v1753_v52 = vsel %vm1750_vm13, %v1745_v55, %v3693_v9 }
 0x5b2   : > { %1884 = vmatpush.bf16.msra.mxu2 %v1753_v52 }
 0x5b8   : > { %v3699_v10 = vpop.permute.xlu0 %1727  ;;  %v1760_v44 = vpop.permute.xlu1 %1759 }
 0x5b9   : > { %v3701_v50 = vpop.permute.xlu2 %1708  ;;  %v1734_v7 = vsel %vm1731_vm14, %v1726_v31, %v3699_v10 }
 0x5ba   : > { %1885 = vmatpush.bf16.msra.mxu2 %v1734_v7  ;;  %v1715_v62 = vsel %vm1712_vm15, %v1707_v37, %v3701_v50  ;;  %v2100_v7 = vld [vmem:[%s3895_s3 + $0x8] sm:$0xff] }
 0x5be   : > { %1886 = vmatpush.bf16.msra.mxu2 %v1715_v62  ;;  %v2101_v62 = vld [vmem:[%s3895_s3 + $0x10] sm:$0xff] }
 0x5c0   : > { %v1741_v3 = vpop.permute.xlu0 %1740  ;;  %v1743_v13 = vpop.permute.xlu1 %1742 }
 0x5c1   : > { %v3707_v36 = vpop.permute.xlu2 %1689  ;;  %v1751_v63 = vsel %vm1750_vm13, %v1741_v3, %v1743_v13  ;;  %v1752_v60 = vsel %vm1750_vm13, %v1743_v13, %v1745_v55  ;;  %v2102_v3 = vpack.c.bf16 %v2100_v7, %v2100_v7  ;;  %v2103_v13 = vpack.c.bf16 %v2101_v62, %v2101_v62 }
 0x5c2   : > { %v1696_v61 = vsel %vm1693_vm0, %v1688_v29, %v3707_v36 }
 0x5c3   : > { %1887 = vmatpush.bf16.msra.mxu2 %v1696_v61  ;;  %2112 = vrot.lane.b32.xlu1 %v2102_v3, %s2767_s9 }
 0x5c4   : > { %2114 = vrot.lane.b32.xlu2 %v2103_v13, %s2767_s9 }
 0x5c8   : > { %v1722_v43 = vpop.permute.xlu0 %1721  ;;  %v1724_v42 = vpop.permute.xlu1 %1723 }
 0x5c9   : > { %v1762_v56 = vpop.permute.xlu2 %1761  ;;  %v1732_v49 = vsel %vm1731_vm14, %v1722_v43, %v1724_v42  ;;  %v1733_v45 = vsel %vm1731_vm14, %v1724_v42, %v1726_v31 }
 0x5ca   : > { %v1770_v20 = vsel %vm1769_vm12, %v1760_v44, %v1762_v56  ;;  %v1771_v48 = vsel %vm1769_vm12, %v1762_v56, %v1764_v38 }
 0x5cb   : > { %1827 = vmatpush.bf16.msrb.mxu3 %v1770_v20  ;;  %1855 = vmatpush.bf16.msra.mxu1 %v1771_v48 }
 0x5cf   : > { %1828 = vmatpush.bf16.msrb.mxu3 %v1751_v63  ;;  %1856 = vmatpush.bf16.msra.mxu1 %v1752_v60 }
 0x5d0   : > { %v1703_v35 = vpop.permute.xlu0 %1702  ;;  %v1705_v33 = vpop.permute.xlu1 %1704 }
 0x5d1   : > { %v1686_v57 = vpop.permute.xlu2 %1685  ;;  %v1713_v46 = vsel %vm1712_vm15, %v1703_v35, %v1705_v33  ;;  %v1714_v25 = vsel %vm1712_vm15, %v1705_v33, %v1707_v37 }
 0x5d2   : > { %v1695_v6 = vsel %vm1693_vm0, %v1686_v57, %v1688_v29 }
 0x5d3   : > { %1829 = vmatpush.bf16.msrb.mxu3 %v1732_v49  ;;  %1857 = vmatpush.bf16.msra.mxu1 %v1733_v45 }
 0x5d7   : > { %1830 = vmatpush.bf16.msrb.mxu3 %v1713_v46  ;;  %1858 = vmatpush.bf16.msra.mxu1 %v1714_v25 }
 0x5d8   : > { %v1779_v11 = vpop.permute.xlu0 %1778  ;;  %v1684_v14 = vpop.permute.xlu1 %1683 }
 0x5d9   : > { %v1667_v26 = vpop.permute.xlu2 %1666  ;;  %v1694_v34 = vsel %vm1693_vm0, %v1684_v14, %v1686_v57  ;;  %v1947_v57 = vld [vmem:[%s3896_s4] sm:$0xf] }
 0x5da   : > { %v1676_v8 = vsel %vm1674_vm2, %v1667_v26, %v3689_v1  ;;  %v1949_v47 = vperm.slane %v1947_v57, 0 }
 0x5db   : > { %1831 = vmatpush.bf16.msrb.mxu3 %v1694_v34  ;;  %1859 = vmatpush.bf16.msra.mxu1 %v1695_v6 }
 0x5df   : > { %1860 = vmatpush.bf16.msra.mxu1 %v1676_v8 }
 0x5e0   : > { %v1768_v30 = vpop.permute.xlu0 %1767  ;;  %v1781_v21 = vpop.permute.xlu1 %1780 }
 0x5e1   : > { %v1789_v18 = vsel %vm1788_vm3, %v1779_v11, %v1781_v21  ;;  %v1648_v16 = vpop.permute.xlu2 %1647  ;;  %v1773_v12 = vsel %vm1769_vm12, %v3687_v58, %v1768_v30  ;;  %v1950_v11 = vperm.slane %v1947_v57, 1 }
 0x5e2   : > { %1848 = vmatpush.bf16.msra.mxu0 %v1789_v18  ;;  %v1657_v5 = vsel %vm1655_vm4, %v1648_v16, %v3695_v41 }
 0x5e3   : > { %1861 = vmatpush.bf16.msra.mxu1 %v1657_v5 }
 0x5e5   : > { %2505 = vmatmul.msk.bf16.vlgmr.msra.gmra.mxu0 %vm430_vm1, %v3398_v32 }
 0x5e7   : > { %1862 = vmatpush.bf16.msra.mxu1 %v3629_v40 }
 0x5e8   : > { %v1749_v0 = vpop.permute.xlu0 %1748  ;;  %v1665_v15 = vpop.permute.xlu1 %1664 }
 0x5e9   : > { %v1783_v24 = vpop.permute.xlu2 %1782  ;;  %v1675_v28 = vsel %vm1674_vm2, %v1665_v15, %v1667_v26  ;;  %v1754_v40 = vsel %vm1750_vm13, %v3693_v9, %v1749_v0 }
 0x5ea   : > { %v1790_v39 = vsel %vm1788_vm3, %v1781_v21, %v1783_v24  ;;  %1863 = vmatmul.bf16.vlgmr.msra.gmra.mxu1 %v1822_v2  ;;  %1832 = vmatpush.bf16.msrb.mxu3 %v1675_v28 }
 0x5eb   : > { %1876 = vmatpush.bf16.msrb.mxu0 %v1790_v39 }
 0x5ef   : > { %1911 = vmatpush.bf16.msra.mxu0 %v1773_v12 }
 0x5f0   : > { %v1730_v19 = vpop.permute.xlu0 %1729  ;;  %v1646_v22 = vpop.permute.xlu1 %1645 }
 0x5f1   : > { %v1652_v23 = vpop.permute.xlu2 %1651  ;;  %v1656_v54 = vsel %vm1655_vm4, %v1646_v22, %v1648_v16  ;;  %v1735_v4 = vsel %vm1731_vm14, %v3699_v10, %v1730_v19 }
 0x5f2   : > { %1833 = vmatpush.bf16.msrb.mxu3 %v1656_v54  ;;  %v1658_v9 = vsel %vm1655_vm4, %v3695_v41, %v1652_v23 }
 0x5f3   : > { %1912 = vmatpush.bf16.msra.mxu0 %v1754_v40 }
 0x5f5   : > { %2506 = vmatmul.msk.bf16.vlgmr.msrb.gmra.mxu0 %vm430_vm1, %v3398_v32 }
 0x5f6   : > { %1834 = vmatpush.bf16.msrb.mxu3 %v3620_v27 }
 0x5f7   : > { %1913 = vmatpush.bf16.msra.mxu0 %v1735_v4 }
 0x5f8   : > { %v1671_v38 = vpop.permute.xlu0 %1670  ;;  %v1711_v55 = vpop.permute.xlu1 %1710 }
 0x5f9   : > { %v1785_v31 = vpop.permute.xlu2 %1784  ;;  %1835 = vmatmul.bf16.vlgmr.msrb.gmra.mxu3 %v1822_v2  ;;  %v1677_v58 = vsel %vm1674_vm2, %v3689_v1, %v1671_v38  ;;  %v1716_v17 = vsel %vm1712_vm15, %v3701_v50, %v1711_v55 }
 0x5fa   : > { %v1791_v37 = vsel %vm1788_vm3, %v1783_v24, %v1785_v31  ;;  %1888 = vmatpush.bf16.msra.mxu2 %v1677_v58 }
 0x5fb   : > { %1914 = vmatpush.bf16.msra.mxu0 %v1716_v17  ;;  %1904 = vmatpush.bf16.msra.mxu3 %v1791_v37 }
 0x5fe   : > { %1889 = vmatpush.bf16.msra.mxu2 %v1658_v9 }
 0x600   : > { %v1673_v27 = vpop.permute.xlu0 %1672  ;;  %v1692_v29 = vpop.permute.xlu1 %1691 }
 0x601   : > { %v1697_v52 = vsel %vm1693_vm0, %v3707_v36, %v1692_v29  ;;  %v1678_v1 = vsel %vm1674_vm2, %v1671_v38, %v1673_v27  ;;  %v1813_v20 = vpop.permute.xlu2 %1812 }
 0x602   : > { %1890 = vmatpush.bf16.msra.mxu2 %v3605_v51  ;;  %1915 = vmatpush.bf16.msra.mxu0 %v1697_v52  ;;  %v1952_v52 = vperm.slane %v1947_v57, 3 }
 0x605   : > { %1891 = vmatmul.bf16.vlgmr.msra.gmra.mxu2 %v1822_v2 }
 0x606   : > { %1916 = vmatpush.bf16.msra.mxu0 %v1678_v1 }
 0x608   : > { %v1787_v10 = vpop.permute.xlu0 %1786  ;;  %v1654_v44 = vpop.permute.xlu1 %1653 }
 0x609   : > { %v1792_v50 = vsel %vm1788_vm3, %v1785_v31, %v1787_v10  ;;  %2507 = vmatmul.msk.bf16.vlgmr.msra.gmra.mxu3 %vm430_vm1, %v3398_v32  ;;  %v1659_v41 = vsel %vm1655_vm4, %v1652_v23, %v1654_v44 }
 0x60a   : > { %1917 = vmatpush.bf16.msra.mxu0 %v1659_v41  ;;  %1932 = vmatpush.bf16.msrb.mxu1 %v1792_v50  ;;  %v1951_v50 = vperm.slane %v1947_v57, 2 }
 0x60d   : > { %2508 = vmatmul.msk.bf16.vlgmr.msrb.gmra.mxu1 %vm430_vm1, %v3398_v32 }
 0x60e   : > { %1918 = vmatpush.bf16.msra.mxu0 %v3603_v53 }
 0x610   : > { %v1808_v43 = vpop.permute.xlu1 %1807 }
 0x611   : > { %1919 = vmatmul.bf16.vlgmr.msra.gmra.mxu0 %v1822_v2 }
 0x662   : > { %v1850_v51 = vpop.f32.mrf.mxu0 }
 0x667   : > { %v1864_v61 = vpop.f32.mrf.mxu1 }
 0x668   : > { %v1865_v48 = vadd.f32 %v1864_v61, %v1808_v43 }
 0x66a   : > { %v1852_v36 = vpop.f32.mrf.mxu0 }
 0x66f   : > { %v1866_v56 = vpop.f32.mrf.mxu1 }
 0x670   : > { %v1867_v33 = vadd.f32 %v1866_v56, %v1813_v20  ;;  %v3834_v56 = vpop.permute.xlu2 %2114 }
 0x672   : > { %v1878_v32 = vpop.f32.mrf.mxu0 }
 0x673   : > { %v1879_v35 = vadd.f32 %v1878_v32, %v1865_v48 }
 0x675   : > { %v1940_v25 = vmax.f32 %v1879_v35, 0.0 }
 0x677   : > { %v1958_v30 = vmul.f32 %v1950_v11, %v1940_v25 }
 0x67a   : > { %v1880_v60 = vpop.f32.mrf.mxu0 }
 0x67b   : > { %v1881_v49 = vadd.f32 %v1880_v60, %v1867_v33 }
 0x67c   : > { %v1836_v53 = vpop.f32.mrf.mxu3 }
 0x67d   : > { %v1837_v42 = vadd.f32 %v1836_v53, %v1808_v43  ;;  %v1944_v26 = vmax.f32 %v1881_v49, 0.0 }
 0x67f   : > { %v1851_v63 = vadd.f32 %v1850_v51, %v1837_v42  ;;  %v1962_v18 = vmul.f32 %v1950_v11, %v1944_v26 }
 0x681   : > { %v1939_v45 = vmax.f32 %v1851_v63, 0.0  ;;  %v2113_v63 = vpop.permute.xlu1 %2112 }
 0x683   : > { %v1957_v34 = vmul.f32 %v1949_v47, %v1939_v45 }
 0x684   : > { %v1838_v46 = vpop.f32.mrf.mxu3 }
 0x685   : > { %v1839_v14 = vadd.f32 %v1838_v46, %v1813_v20  ;;  %v1965_v16 = vpack.c.bf16 %v1958_v30, %v1957_v34 }
 0x687   : > { %v1853_v6 = vadd.f32 %v1852_v36, %v1839_v14  ;;  %v1973_v28 = vunpack.c.l.b16 %v1965_v16  ;;  %v1974_v39 = vunpack.c.h.b16 %v1965_v16 }
 0x688   : > { %v1892_v8 = vpop.f32.mrf.mxu2 }
 0x689   : > { %v1943_v21 = vmax.f32 %v1853_v6, 0.0  ;;  %v1893_v55 = vadd.f32 %v1892_v8, %v1808_v43 }
 0x68a   : > { %v1934_v2 = vpop.f32.mrf.mxu1 }
 0x68b   : > { %v1961_v5 = vmul.f32 %v1949_v47, %v1943_v21 }
 0x68c   : > { %v1906_v0 = vpop.f32.mrf.mxu3 }
 0x68d   : > { %v1967_v15 = vpack.c.bf16 %v1962_v18, %v1961_v5  ;;  %v1907_v9 = vadd.f32 %v1906_v0, %v1893_v55 }
 0x68e   : > { %v1920_v24 = vpop.f32.mrf.mxu0 }
 0x68f   : > { %v1976_v12 = vunpack.c.l.b16 %v1967_v15  ;;  %v1977_v40 = vunpack.c.h.b16 %v1967_v15  ;;  %v1921_v54 = vadd.f32 %v1920_v24, %v1808_v43  ;;  %v1941_v44 = vmax.f32 %v1907_v9, 0.0  ;;  %v2104_v24 = vld [vmem:[%s3894_s2] sm:$0xff] }
 0x690   : > { %v1894_v23 = vpop.f32.mrf.mxu2 }
 0x691   : > { %v3774_v19 = vpack.c.b16 %v1976_v12, %v1973_v28  ;;  %v3776_v22 = vpack.c.b16 %v1977_v40, %v1974_v39  ;;  %v1895_v59 = vadd.f32 %v1894_v23, %v1813_v20  ;;  %v1935_v31 = vadd.f32 %v1934_v2, %v1921_v54 }
 0x692   : > { %v1936_v37 = vpop.f32.mrf.mxu1  ;;  %v1959_v62 = vmul.f32 %v1951_v50, %v1941_v44  ;;  %v2768_v39 = vmov 25  }
 0x693   : > { %2074 = vrot.lane.b32.xlu1 %v3776_v22, %s2758_s18  ;;  %2058 = vrot.lane.b32.xlu2 %v3774_v19, %s2760_s20  ;;  %v1942_v29 = vmax.f32 %v1935_v31, 0.0 }
 0x694   : > { %2072 = vrot.lane.b32.xlu0 %v3774_v19, %s2758_s18  ;;  %v1908_v4 = vpop.f32.mrf.mxu3  ;;  %2683 = vset.pattern.permute.xlu1 %v2768_v39 }
 0x695   : > { %v1909_v58 = vadd.f32 %v1908_v4, %v1895_v59  ;;  %v1960_v51 = vmul.f32 %v1952_v52, %v1942_v29  ;;  %2684 = vset.pattern.permute.xlu0 %v2768_v39  ;;  %v2117_v59 = vsel %vm1200_vm7, %v2113_v63, %v3834_v56 }
 0x696   : > { %v1922_v38 = vpop.f32.mrf.mxu0 }
 0x697   : > { %v1923_v17 = vadd.f32 %v1922_v38, %v1813_v20  ;;  %v1945_v1 = vmax.f32 %v1909_v58, 0.0  ;;  %v1966_v13 = vpack.c.bf16 %v1960_v51, %v1959_v62 }
 0x699   : > { %v1937_v27 = vadd.f32 %v1936_v37, %v1923_v17  ;;  %v1963_v7 = vmul.f32 %v1951_v50, %v1945_v1  ;;  %v1975_v61 = vunpack.c.l.b16 %v1966_v13  ;;  %v1985_v53 = vunpack.c.h.b16 %v1966_v13 }
 0x69b   : > { %v1946_v10 = vmax.f32 %v1937_v27, 0.0  ;;  %2044 = vrot.lane.b32.xlu1 %v3774_v19, %s2762_s24  ;;  %2046 = vrot.lane.b32.xlu2 %v3776_v22, %s2762_s24 }
 0x69c   : > { %2060 = vrot.lane.b32.xlu0 %v3776_v22, %s2760_s20 }
 0x69d   : > { %v1964_v41 = vmul.f32 %v1952_v52, %v1946_v10 }
 0x69f   : > { %v1968_v3 = vpack.c.bf16 %v1964_v41, %v1963_v7 }
 0x6a1   : > { %v1978_v36 = vunpack.c.l.b16 %v1968_v3  ;;  %v1986_v43 = vunpack.c.h.b16 %v1968_v3 }
 0x6a3   : > { %2032 = vrot.lane.b32.xlu1 %v3776_v22, %s2763_s25  ;;  %1990 = vrot.lane.b32.xlu2 %v3776_v22, %s2761_s23  ;;  %v3796_v32 = vpack.c.b16 %v1978_v36, %v1975_v61  ;;  %v1987_v42 = vpack.c.b16 %v1986_v43, %v1985_v53 }
 0x6a4   : > { %2030 = vrot.lane.b32.xlu0 %v3774_v19, %s2763_s25 }
 0x6ab   : > { %2018 = vrot.lane.b32.xlu1 %v3776_v22, %s2764_s26  ;;  %2076 = vrot.lane.b32.xlu2 %v3796_v32, %s2758_s18 }
 0x6ac   : > { %2016 = vrot.lane.b32.xlu0 %v3774_v19, %s2764_s26 }
 0x6b3   : > { %2004 = vrot.lane.b32.xlu1 %v3776_v22, %s2759_s19  ;;  %2062 = vrot.lane.b32.xlu2 %v3796_v32, %s2760_s20 }
 0x6b4   : > { %2002 = vrot.lane.b32.xlu0 %v3774_v19, %s2759_s19 }
 0x6bb   : > { %1988 = vrot.lane.b32.xlu1 %v3774_v19, %s2761_s23  ;;  %2078 = vrot.lane.b32.xlu2 %v1987_v42, %s2758_s18 }
 0x6bc   : > { %2048 = vrot.lane.b32.xlu0 %v3796_v32, %s2762_s24 }
 0x6c3   : > { %2034 = vrot.lane.b32.xlu1 %v3796_v32, %s2763_s25  ;;  %2088 = vrot.lane.b32.xlu2 %v3776_v22, %s2745_s13 }
 0x6c4   : > { %2064 = vrot.lane.b32.xlu0 %v1987_v42, %s2760_s20 }
 0x6cb   : > { %2086 = vrot.lane.b32.xlu1 %v3774_v19, %s2745_s13  ;;  %2050 = vrot.lane.b32.xlu2 %v1987_v42, %s2762_s24 }
 0x6cc   : > { %2020 = vrot.lane.b32.xlu0 %v3796_v32, %s2764_s26 }
 0x6d3   : > { %2022 = vrot.lane.b32.xlu1 %v1987_v42, %s2764_s26  ;;  %1992 = vrot.lane.b32.xlu2 %v3796_v32, %s2761_s23 }
 0x6d4   : > { %2036 = vrot.lane.b32.xlu0 %v1987_v42, %s2763_s25 }
 0x6db   : > { %1994 = vrot.lane.b32.xlu1 %v1987_v42, %s2761_s23  ;;  %2090 = vrot.lane.b32.xlu2 %v3796_v32, %s2745_s13 }
 0x6dc   : > { %2006 = vrot.lane.b32.xlu0 %v3796_v32, %s2759_s19 }
 0x6e3   : > { %2107 = vperm.xlu1 %2683, %v2104_v24  }
 0x6e4   : > { %2008 = vrot.lane.b32.xlu0 %v1987_v42, %s2759_s19 }
 0x6ec   : > { %2092 = vrot.lane.b32.xlu0 %v1987_v42, %s2745_s13 }
 0x6ed   : > { %v2059_v20 = vpop.permute.xlu2 %2058 }
 0x6f5   : > { %v2047_v48 = vpop.permute.xlu2 %2046 }
 0x6fd   : > { %v3838_v60 = vpop.permute.xlu2 %1990 }
 0x705   : > { %v2075_v35 = vpop.permute.xlu1 %2074  ;;  %v2077_v33 = vpop.permute.xlu2 %2076 }
 0x706   : > { %v2073_v57 = vpop.permute.xlu0 %2072  ;;  %v2081_v49 = vsel %vm1769_vm12, %v2075_v35, %v2077_v33 }
 0x707   : > { %v2080_v45 = vsel %vm1769_vm12, %v2073_v57, %v2075_v35  ;;  %2148 = vmatpush.bf16.msrb.mxu2 %v2081_v49 }
 0x708   : > { %2122 = vmatpush.bf16.msrb.mxu3 %v2080_v45 }
 0x70d   : > { %v2045_v47 = vpop.permute.xlu1 %2044  ;;  %v2063_v46 = vpop.permute.xlu2 %2062 }
 0x70e   : > { %v2061_v25 = vpop.permute.xlu0 %2060  ;;  %v2052_v26 = vsel %vm1731_vm14, %v2045_v47, %v2047_v48 }
 0x70f   : > { %v2066_v11 = vsel %vm1750_vm13, %v2059_v20, %v2061_v25  ;;  %v2067_v14 = vsel %vm1750_vm13, %v2061_v25, %v2063_v46 }
 0x710   : > { %2123 = vmatpush.bf16.msrb.mxu3 %v2066_v11  ;;  %2149 = vmatpush.bf16.msrb.mxu2 %v2067_v14 }
 0x714   : > { %2124 = vmatpush.bf16.msrb.mxu3 %v2052_v26 }
 0x715   : > { %v2033_v34 = vpop.permute.xlu1 %2032  ;;  %v2079_v6 = vpop.permute.xlu2 %2078 }
 0x716   : > { %v2031_v8 = vpop.permute.xlu0 %2030  ;;  %v2082_v27 = vsel %vm1769_vm12, %v2077_v33, %v2079_v6 }
 0x717   : > { %v2038_v30 = vsel %vm1712_vm15, %v2031_v8, %v2033_v34 }
 0x718   : > { %2125 = vmatpush.bf16.msrb.mxu3 %v2038_v30 }
 0x71d   : > { %v2019_v21 = vpop.permute.xlu1 %2018  ;;  %v2089_v18 = vpop.permute.xlu2 %2088 }
 0x71e   : > { %v2017_v16 = vpop.permute.xlu0 %2016 }
 0x71f   : > { %v2024_v5 = vsel %vm1693_vm0, %v2017_v16, %v2019_v21 }
 0x720   : > { %2126 = vmatpush.bf16.msrb.mxu3 %v2024_v5 }
 0x725   : > { %v2005_v0 = vpop.permute.xlu1 %2004  ;;  %v2051_v15 = vpop.permute.xlu2 %2050 }
 0x726   : > { %v2003_v2 = vpop.permute.xlu0 %2002 }
 0x727   : > { %v2010_v28 = vsel %vm1674_vm2, %v2003_v2, %v2005_v0 }
 0x728   : > { %2127 = vmatpush.bf16.msrb.mxu3 %v2010_v28 }
 0x72d   : > { %v1989_v12 = vpop.permute.xlu1 %1988  ;;  %v1993_v40 = vpop.permute.xlu2 %1992 }
 0x72e   : > { %v2049_v23 = vpop.permute.xlu0 %2048  ;;  %v1996_v54 = vsel %vm1655_vm4, %v1989_v12, %v3838_v60  ;;  %v1997_v62 = vsel %vm1655_vm4, %v3838_v60, %v1993_v40 }
 0x72f   : > { %2128 = vmatpush.bf16.msrb.mxu3 %v1996_v54  ;;  %v2053_v4 = vsel %vm1731_vm14, %v2047_v48, %v2049_v23  ;;  %v2054_v10 = vsel %vm1731_vm14, %v2049_v23, %v2051_v15 }
 0x730   : > { %2150 = vmatpush.bf16.msrb.mxu2 %v2053_v4 }
 0x733   : > { %2129 = vmatpush.bf16.msrb.mxu3 %v3774_v19 }
 0x735   : > { %v2035_v38 = vpop.permute.xlu1 %2034  ;;  %v2091_v55 = vpop.permute.xlu2 %2090 }
 0x736   : > { %v2065_v31 = vpop.permute.xlu0 %2064  ;;  %v2095_v58 = vsel %vm1788_vm3, %v2089_v18, %v2091_v55  ;;  %2130 = vmatmul.bf16.vlgmr.msrb.gmra.mxu3 %v2117_v59  ;;  %v2039_v17 = vsel %vm1712_vm15, %v2033_v34, %v2035_v38 }
 0x737   : > { %2151 = vmatpush.bf16.msrb.mxu2 %v2039_v17  ;;  %2168 = vmatpush.bf16.msrb.mxu0 %v2095_v58  ;;  %v2068_v52 = vsel %vm1750_vm13, %v2063_v46, %v2065_v31 }
 0x73a   : > { %2510 = vmatmul.msk.bf16.vlgmr.msrb.gmra.mxu0 %vm430_vm1, %v3834_v56 }
 0x73d   : > { %v2087_v37 = vpop.permute.xlu1 %2086 }
 0x73e   : > { %v2094_v9 = vsel %vm1788_vm3, %v2087_v37, %v2089_v18  ;;  %v2021_v19 = vpop.permute.xlu0 %2020 }
 0x73f   : > { %2142 = vmatpush.bf16.msra.mxu1 %v2094_v9  ;;  %v2025_v29 = vsel %vm1693_vm0, %v2019_v21, %v2021_v19 }
 0x740   : > { %2152 = vmatpush.bf16.msrb.mxu2 %v2025_v29 }
 0x742   : > { %2509 = vmatmul.msk.bf16.vlgmr.msra.gmra.mxu1 %vm430_vm1, %v3834_v56 }
 0x743   : > { %2174 = vmatpush.bf16.msrb.mxu1 %v2082_v27 }
 0x745   : > { %v2023_v50 = vpop.permute.xlu1 %2022 }
 0x746   : > { %v2037_v1 = vpop.permute.xlu0 %2036  ;;  %v2026_v7 = vsel %vm1693_vm0, %v2021_v19, %v2023_v50 }
 0x747   : > { %2175 = vmatpush.bf16.msrb.mxu1 %v2068_v52  ;;  %v2040_v44 = vsel %vm1712_vm15, %v2035_v38, %v2037_v1 }
 0x74b   : > { %2176 = vmatpush.bf16.msrb.mxu1 %v2054_v10 }
 0x74d   : > { %v1995_v36 = vpop.permute.xlu1 %1994 }
 0x74e   : > { %v2007_v41 = vpop.permute.xlu0 %2006  ;;  %v1998_v61 = vsel %vm1655_vm4, %v1993_v40, %v1995_v36 }
 0x74f   : > { %2177 = vmatpush.bf16.msrb.mxu1 %v2040_v44  ;;  %v2011_v51 = vsel %vm1674_vm2, %v2005_v0, %v2007_v41 }
 0x750   : > { %2153 = vmatpush.bf16.msrb.mxu2 %v2011_v51 }
 0x753   : > { %2178 = vmatpush.bf16.msrb.mxu1 %v2026_v7 }
 0x754   : > { %2154 = vmatpush.bf16.msrb.mxu2 %v1997_v62 }
 0x755   : > { %v2108_v48 = vpop.permute.xlu1 %2107 }
 0x756   : > { %v2009_v3 = vpop.permute.xlu0 %2008 }
 0x757   : > { %v2012_v13 = vsel %vm1674_vm2, %v2007_v41, %v2009_v3 }
 0x758   : > { %2155 = vmatpush.bf16.msrb.mxu2 %v3776_v22  ;;  %2179 = vmatpush.bf16.msrb.mxu1 %v2012_v13 }
 0x75b   : > { %2156 = vmatmul.bf16.vlgmr.msrb.gmra.mxu2 %v2117_v59 }
 0x75c   : > { %2180 = vmatpush.bf16.msrb.mxu1 %v1998_v61 }
 0x75e   : > { %v2093_v43 = vpop.permute.xlu0 %2092 }
 0x75f   : > { %v2096_v53 = vsel %vm1788_vm3, %v2091_v55, %v2093_v43 }
 0x760   : > { %2181 = vmatpush.bf16.msrb.mxu1 %v3796_v32  ;;  %2194 = vmatpush.bf16.msra.mxu3 %v2096_v53 }
 0x763   : > { %2182 = vmatmul.bf16.vlgmr.msrb.gmra.mxu1 %v2117_v59  ;;  %2511 = vmatmul.msk.bf16.vlgmr.msra.gmra.mxu3 %vm430_vm1, %v3834_v56 }
 0x7b7   : > { %v2170_v42 = vpop.f32.mrf.mxu0 }
 0x7b9   : > { %v2131_v20 = vpop.f32.mrf.mxu3 }
 0x7ba   : > { %v2132_v22 = vadd.f32 %v2131_v20, %v2108_v48 }
 0x7bf   : > { %v2144_v63 = vpop.f32.mrf.mxu1  ;;  %v2172_v60 = vpop.f32.mrf.mxu0 }
 0x7c0   : > { %v2145_v35 = vadd.f32 %v2144_v63, %v2132_v22 }
 0x7c1   : > { %v2133_v33 = vpop.f32.mrf.mxu3 }
 0x7c2   : > { %v2512_v57 = vmul.f32 -1.442695, %v2145_v35 }
 0x7c4   : > { %2685 = vpow2.f32 %v2512_v57 }
 0x7c7   : > { %v2146_v49 = vpop.f32.mrf.mxu1 }
 0x7ca   : > { %v2686_v45 = vpop.eup %2685 }
 0x7cb   : > { %v2209_v47 = vadd.f32 1.0, %v2686_v45 }
 0x7cd   : > { %2687 = vrcp.f32 %v2209_v47  ;;  %v2223_v56 = vand.u32 2147483648, %v2209_v47  ;;  %v2221_v14 = vand.u32 2147483647, %v2209_v47  ;;  %vm2217_vm7 = vweird.f32 %v2209_v47 }
 0x7cf   : > { %v2224_v34 = vor.u32 1.1754944e-38, %v2223_v56  ;;  %vm2222_vm8 = vcmp.eq.f32.partialorder %v2221_v14, 8.507059e+37 }
 0x7d3   : > { %v2688_v32 = vpop.eup %2687 }
 0x7d4   : > { %v2213_v46 = vmul.f32 %v2688_v32, %v2209_v47  ;;  %vm2218_vm1 = vweird.f32 %v2688_v32 }
 0x7d5   : > { %vm2219_vm6 = vmor %vm2217_vm7, %vm2218_vm1 }
 0x7d6   : > { %v2214_v25 = vsub.f32 1.0, %v2213_v46 }
 0x7d8   : > { %v2215_v11 = vmul.f32 %v2688_v32, %v2214_v25 }
 0x7da   : > { %v2216_v26 = vadd.f32 %v2688_v32, %v2215_v11 }
 0x7dc   : > { %v2220_v6 = vsel %vm2219_vm6, %v2688_v32, %v2216_v26 }
 0x7dd   : > { %v2225_v8 = vsel %vm2222_vm8, %v2224_v34, %v2220_v6 }
 0x7de   : > { %2257 = vst [vmem:[%s3884_s17] sm:$0xff] %v2225_v8  ;;  %v2157_v30 = vpop.f32.mrf.mxu2 }
 0x7df   : > { %v2158_v21 = vadd.f32 %v2157_v30, %v2108_v48 }
 0x7e0   : > { %v2183_v18 = vpop.f32.mrf.mxu1 }
 0x7e1   : > { %v2171_v16 = vadd.f32 %v2170_v42, %v2158_v21  ;;  %v2184_v0 = vadd.f32 %v2183_v18, %v2108_v48 }
 0x7e3   : > { %v2513_v5 = vmul.f32 -1.442695, %v2171_v16 }
 0x7e5   : > { %2689 = vpow2.f32 %v2513_v5 }
 0x7e6   : > { %v2159_v15 = vpop.f32.mrf.mxu2  ;;  %v2196_v2 = vpop.f32.mrf.mxu3 }
 0x7e7   : > { %v2197_v24 = vadd.f32 %v2196_v2, %v2184_v0 }
 0x7e8   : > { %v2185_v28 = vpop.f32.mrf.mxu1 }
 0x7e9   : > { %v2514_v39 = vmul.f32 -1.442695, %v2197_v24 }
 0x7eb   : > { %v2690_v12 = vpop.eup %2689  ;;  %2691 = vpow2.f32 %v2514_v39 }
 0x7ec   : > { %v2210_v40 = vadd.f32 1.0, %v2690_v12 }
 0x7ee   : > { %2693 = vrcp.f32 %v2210_v40  ;;  %v2198_v23 = vpop.f32.mrf.mxu3  ;;  %v2238_v31 = vand.u32 2147483648, %v2210_v40  ;;  %v2236_v17 = vand.u32 2147483647, %v2210_v40  ;;  %vm2232_vm10 = vweird.f32 %v2210_v40 }
 0x7f0   : > { %v2239_v27 = vor.u32 1.1754944e-38, %v2238_v31  ;;  %vm2237_vm12 = vcmp.eq.f32.partialorder %v2236_v17, 8.507059e+37 }
 0x7f1   : > { %v2692_v54 = vpop.eup %2691 }
 0x7f2   : > { %v2211_v4 = vadd.f32 1.0, %v2692_v54 }
 0x7f4   : > { %v2694_v59 = vpop.eup %2693  ;;  %2695 = vrcp.f32 %v2211_v4  ;;  %v2253_v10 = vand.u32 2147483648, %v2211_v4  ;;  %v2251_v50 = vand.u32 2147483647, %v2211_v4  ;;  %vm2247_vm14 = vweird.f32 %v2211_v4 }
 0x7f5   : > { %v2228_v38 = vmul.f32 %v2694_v59, %v2210_v40  ;;  %vm2233_vm9 = vweird.f32 %v2694_v59 }
 0x7f6   : > { %vm2234_vm11 = vmor %vm2232_vm10, %vm2233_vm9  ;;  %v2254_v51 = vor.u32 1.1754944e-38, %v2253_v10  ;;  %vm2252_vm0 = vcmp.eq.f32.partialorder %v2251_v50, 8.507059e+37 }
 0x7f7   : > { %v2229_v55 = vsub.f32 1.0, %v2228_v38 }
 0x7f9   : > { %v2230_v58 = vmul.f32 %v2694_v59, %v2229_v55 }
 0x7fa   : > { %v2696_v37 = vpop.eup %2695 }
 0x7fb   : > { %v2231_v9 = vadd.f32 %v2694_v59, %v2230_v58  ;;  %v2243_v19 = vmul.f32 %v2696_v37, %v2211_v4  ;;  %vm2248_vm13 = vweird.f32 %v2696_v37 }
 0x7fc   : > { %vm2249_vm15 = vmor %vm2247_vm14, %vm2248_vm13 }
 0x7fd   : > { %v2235_v29 = vsel %vm2234_vm11, %v2694_v59, %v2231_v9  ;;  %v2244_v52 = vsub.f32 1.0, %v2243_v19 }
 0x7fe   : > { %v2240_v1 = vsel %vm2237_vm12, %v2239_v27, %v2235_v29 }
 0x7ff   : > { %2258 = vst [vmem:[%s3884_s17 + $0x8] sm:$0xff] %v2240_v1  ;;  %v2245_v44 = vmul.f32 %v2696_v37, %v2244_v52 }
 0x801   : > { %v2246_v41 = vadd.f32 %v2696_v37, %v2245_v44 }
 0x803   : > { %v2250_v7 = vsel %vm2249_vm15, %v2696_v37, %v2246_v41 }
 0x804   : > { %v2255_v62 = vsel %vm2252_vm0, %v2254_v51, %v2250_v7 }
 0x805   : > { %2259 = vst [vmem:[%s3884_s17 + $0x10] sm:$0xff] %v2255_v62 }
 0x806 PF: > { %s16_s21 = sadd.s32 1, %s2704_s21  }
 0x807   : > { %p13_p4 = scmp.ge.s32.totalorder %s16_s21, 4  }
 0x809   :  { %15 = sbr.rel (!%p13_p4) target bundleno = 1 (0x1), region = 77 }

</bundles_post_ra>
